<compile_context>
chip_gen: v5e
topology: v5e:2x2
jax: 0.10.0
libtpu: 0.0.40
codegen_flags: <defaults>
</compile_context>

<pallas_src>
import jax
import jax.numpy as jnp
from jax.experimental import pallas as pl
from jax.experimental.pallas import tpu as pltpu


H1_PAD = 1024   # 1000 padded to a lane multiple
H2_PAD = 256    # 200 padded to a lane multiple
OUT_LANES = 128 # lane-dense output slab width


def _round_up(n, m):
    return ((n + m - 1) // m) * m


def mlp_kernel(x_ref, w1_ref, b1_ref, w2_ref, b2_ref, w3_ref, b3_ref, o_ref):
    # fc1 + relu: bf16 MXU operands, f32 accumulate, f32 elementwise.
    h1 = jnp.dot(x_ref[...], w1_ref[...], preferred_element_type=jnp.float32)
    h1 = jnp.maximum(h1 + b1_ref[...], 0.0)
    # fc2 + relu.
    h2 = jnp.dot(h1.astype(jnp.bfloat16), w2_ref[...],
                 preferred_element_type=jnp.float32)
    h2 = jnp.maximum(h2 + b2_ref[...], 0.0)
    # fc3: N=1, so do a VPU multiply + XLU lane-reduce instead of an MXU matmul.
    y = jnp.sum(h2 * w3_ref[...], axis=-1, keepdims=True) + b3_ref[...]  # [TB, 1]
    # Lane-dense store: broadcast the scalar column across 128 lanes
    # (unmasked vst); the caller slices column 0.
    o_ref[...] = jnp.broadcast_to(y, o_ref.shape).astype(o_ref.dtype)


def regression_model_forward(x, kernel_params):
    """x: [B, input_size] float32 -> [B, 1] float32."""
    w1, b1, w2, b2, w3_row, b3 = kernel_params
    B, F = x.shape
    H1 = w1.shape[1]
    H2 = w2.shape[1]

    # Batch tile: multiple of 8 (sublane), capped at 256.
    tb = min(256, _round_up(B, 8))
    b_pad = _round_up(B, tb)
    num_tiles = b_pad // tb

    xb = x.astype(jnp.bfloat16)
    if b_pad != B:
        xb = jnp.pad(xb, ((0, b_pad - B), (0, 0)))

    out = pl.pallas_call(
        mlp_kernel,
        out_shape=jax.ShapeDtypeStruct((b_pad, OUT_LANES), jnp.float32),
        grid=(num_tiles,),
        in_specs=[
            pl.BlockSpec((tb, F), lambda i: (i, 0)),      # x: tiled over batch
            pl.BlockSpec((F, H1), lambda i: (0, 0)),      # w1: resident
            pl.BlockSpec((1, H1), lambda i: (0, 0)),      # b1: resident
            pl.BlockSpec((H1, H2), lambda i: (0, 0)),     # w2: resident
            pl.BlockSpec((1, H2), lambda i: (0, 0)),      # b2: resident
            pl.BlockSpec((1, H2), lambda i: (0, 0)),      # w3 row: resident
            pl.BlockSpec((1, 1), lambda i: (0, 0)),       # b3: resident
        ],
        out_specs=pl.BlockSpec((tb, OUT_LANES), lambda i: (i, 0)),
        compiler_params=pltpu.CompilerParams(
            dimension_semantics=("parallel",)),
    )(xb, w1, b1, w2, b2, w3_row, b3)

    return out[:B, :1]


def init_params(key, input_size):
    """Master (logical) f32 params, stored as [in, out] (transpose of PyTorch).

    Xavier-normal weights (init.xavier_normal_), PyTorch-default uniform biases.
    """
    k1, k2, k3, kb1, kb2, kb3 = jax.random.split(key, 6)

    def xavier(k, fan_in, fan_out):
        std = jnp.sqrt(2.0 / (fan_in + fan_out))
        return jax.random.normal(k, (fan_in, fan_out), jnp.float32) * std

    def bias(k, fan_in, fan_out):
        bound = 1.0 / jnp.sqrt(fan_in)
        return jax.random.uniform(k, (1, fan_out), jnp.float32, -bound, bound)

    w1 = xavier(k1, input_size, 1000)
    b1 = bias(kb1, input_size, 1000)
    w2 = xavier(k2, 1000, 200)
    b2 = bias(kb2, 1000, 200)
    w3 = xavier(k3, 200, 1)
    b3 = bias(kb3, 200, 1)
    return (w1, b1, w2, b2, w3, b3)


def prepare_kernel_params(params):
    """Pad hidden dims to lane multiples, cast MXU operands to bf16,
    store w3 as a [1, H2_PAD] row (it is a VPU reduce, kept in f32)."""
    w1, b1, w2, b2, w3, b3 = params
    F, H1 = w1.shape
    H2 = w2.shape[1]

    w1p = jnp.zeros((F, H1_PAD), jnp.float32).at[:, :H1].set(w1).astype(jnp.bfloat16)
    b1p = jnp.zeros((1, H1_PAD), jnp.float32).at[:, :H1].set(b1)
    w2p = jnp.zeros((H1_PAD, H2_PAD), jnp.float32).at[:H1, :H2].set(w2).astype(jnp.bfloat16)
    b2p = jnp.zeros((1, H2_PAD), jnp.float32).at[:, :H2].set(b2)
    w3row = jnp.zeros((1, H2_PAD), jnp.float32).at[:, :H2].set(w3[:, 0][None, :])
    b3p = b3.reshape(1, 1).astype(jnp.float32)
    return (w1p, b1p, w2p, b2p, w3row, b3p)


def reference_forward_f32(x, params):
    """Exact f32 semantics of the PyTorch module."""
    w1, b1, w2, b2, w3, b3 = params
    h1 = jnp.maximum(x @ w1 + b1, 0.0)
    h2 = jnp.maximum(h1 @ w2 + b2, 0.0)
    return h2 @ w3 + b3


def reference_forward_bf16(x, params):
    """Reference that mirrors the kernel's numerics (bf16 MXU operands,
    f32 accumulation / elementwise, fc3 as an f32 reduce)."""
    w1, b1, w2, b2, w3, b3 = params
    h1 = jnp.dot(x.astype(jnp.bfloat16), w1.astype(jnp.bfloat16),
                 preferred_element_type=jnp.float32)
    h1 = jnp.maximum(h1 + b1, 0.0)
    h2 = jnp.dot(h1.astype(jnp.bfloat16), w2.astype(jnp.bfloat16),
                 preferred_element_type=jnp.float32)
    h2 = jnp.maximum(h2 + b2, 0.0)
    return jnp.sum(h2 * w3[:, 0][None, :], axis=-1, keepdims=True) + b3


if __name__ == "__main__":
    key = jax.random.PRNGKey(0)
    kx, kp = jax.random.split(key)

    batch = 32          # matches self.batch_size in the module
    input_size = 16     # small synthetic feature count

    x = jax.random.normal(kx, (batch, input_size), jnp.float32)
    params = init_params(kp, input_size)
    kparams = prepare_kernel_params(params)

    out = regression_model_forward(x, kparams)
    out = jax.block_until_ready(out)
    assert out.shape == (batch, 1)

    # Tight check against the bf16-matched reference (same numerics as kernel).
    ref_bf16 = reference_forward_bf16(x, params)
    assert jnp.allclose(out, ref_bf16, atol=1e-4, rtol=1e-4), (
        float(jnp.max(jnp.abs(out - ref_bf16))))

    # Loose check against the exact f32 module semantics (bf16 MXU rounding).
    ref_f32 = reference_forward_f32(x, params)
    assert jnp.allclose(out, ref_f32, atol=2e-2, rtol=2e-2), (
        float(jnp.max(jnp.abs(out - ref_f32))))

    # TODO(synk): training (fit/MSELoss/Adam/StepLR) is not part of the forward
    # pass and is not implemented as a kernel.
    print("KERNEL_OK")
</pallas_src>

<mosaic_0001>
module attributes {stable_mosaic.version = 11 : i64} {
  func.func @mlp_kernel(%arg0: i32, %arg1: memref<32x16xbf16, #tpu.memory_space<vmem>>, %arg2: memref<16x1024xbf16, #tpu.memory_space<vmem>>, %arg3: memref<1x1024xf32, #tpu.memory_space<vmem>>, %arg4: memref<1024x256xbf16, #tpu.memory_space<vmem>>, %arg5: memref<1x256xf32, #tpu.memory_space<vmem>>, %arg6: memref<1x256xf32, #tpu.memory_space<vmem>>, %arg7: memref<1x1xf32, #tpu.memory_space<vmem>>, %arg8: memref<32x128xf32, #tpu.memory_space<vmem>>) attributes {dimension_semantics = [#tpu.dimension_semantics<parallel>], iteration_bounds = array<i64: 1>, scalar_prefetch = 0 : i64, scratch_operands = 0 : i64, tpu.core_type = #tpu.core_type<tc>, window_params = [{transform_indices = @transform_0, window_bounds = array<i64: 32, 16>}, {pipeline_mode = #tpu.pipeline_mode<synchronous>, transform_indices = @transform_1, window_bounds = array<i64: 16, 1024>}, {pipeline_mode = #tpu.pipeline_mode<synchronous>, transform_indices = @transform_2, window_bounds = array<i64: 1, 1024>}, {pipeline_mode = #tpu.pipeline_mode<synchronous>, transform_indices = @transform_3, window_bounds = array<i64: 1024, 256>}, {pipeline_mode = #tpu.pipeline_mode<synchronous>, transform_indices = @transform_4, window_bounds = array<i64: 1, 256>}, {pipeline_mode = #tpu.pipeline_mode<synchronous>, transform_indices = @transform_5, window_bounds = array<i64: 1, 256>}, {pipeline_mode = #tpu.pipeline_mode<synchronous>, transform_indices = @transform_6, window_bounds = array<i64: 1, 1>}, {transform_indices = @transform_7, window_bounds = array<i64: 32, 128>}]} {
    %c0 = arith.constant 0 : index
    %c0_0 = arith.constant 0 : index
    %0 = vector.load %arg1[%c0, %c0_0] : memref<32x16xbf16, #tpu.memory_space<vmem>>, vector<32x16xbf16>
    %c0_1 = arith.constant 0 : index
    %c0_2 = arith.constant 0 : index
    %1 = vector.load %arg2[%c0_1, %c0_2] : memref<16x1024xbf16, #tpu.memory_space<vmem>>, vector<16x1024xbf16>
    %cst = arith.constant dense<0.000000e+00> : vector<32x1024xf32>
    %2 = tpu.matmul %0, %1, %cst {dimension_numbers = #tpu.dot_dimension_numbers<[1], [0], [0], [1], [0, 0, 1, 1], [], []>} : vector<32x16xbf16>, vector<16x1024xbf16>, vector<32x1024xf32> -> vector<32x1024xf32>
    %c0_3 = arith.constant 0 : index
    %c0_4 = arith.constant 0 : index
    %3 = vector.load %arg3[%c0_3, %c0_4] : memref<1x1024xf32, #tpu.memory_space<vmem>>, vector<1x1024xf32>
    %4 = vector.broadcast %3 : vector<1x1024xf32> to vector<32x1024xf32>
    %5 = arith.addf %2, %4 : vector<32x1024xf32>
    %cst_5 = arith.constant 0.000000e+00 : f32
    %6 = vector.broadcast %cst_5 : f32 to vector<32x1024xf32>
    %7 = arith.maximumf %5, %6 : vector<32x1024xf32>
    %8 = arith.truncf %7 : vector<32x1024xf32> to vector<32x1024xbf16>
    %c0_6 = arith.constant 0 : index
    %c0_7 = arith.constant 0 : index
    %9 = vector.load %arg4[%c0_6, %c0_7] : memref<1024x256xbf16, #tpu.memory_space<vmem>>, vector<1024x256xbf16>
    %cst_8 = arith.constant dense<0.000000e+00> : vector<32x256xf32>
    %10 = tpu.matmul %8, %9, %cst_8 {dimension_numbers = #tpu.dot_dimension_numbers<[1], [0], [0], [1], [0, 0, 1, 1], [], []>} : vector<32x1024xbf16>, vector<1024x256xbf16>, vector<32x256xf32> -> vector<32x256xf32>
    %c0_9 = arith.constant 0 : index
    %c0_10 = arith.constant 0 : index
    %11 = vector.load %arg5[%c0_9, %c0_10] : memref<1x256xf32, #tpu.memory_space<vmem>>, vector<1x256xf32>
    %12 = vector.broadcast %11 : vector<1x256xf32> to vector<32x256xf32>
    %13 = arith.addf %10, %12 : vector<32x256xf32>
    %cst_11 = arith.constant 0.000000e+00 : f32
    %14 = vector.broadcast %cst_11 : f32 to vector<32x256xf32>
    %15 = arith.maximumf %13, %14 : vector<32x256xf32>
    %c0_12 = arith.constant 0 : index
    %c0_13 = arith.constant 0 : index
    %16 = vector.load %arg6[%c0_12, %c0_13] : memref<1x256xf32, #tpu.memory_space<vmem>>, vector<1x256xf32>
    %17 = vector.broadcast %16 : vector<1x256xf32> to vector<32x256xf32>
    %18 = arith.mulf %15, %17 : vector<32x256xf32>
    %cst_14 = arith.constant dense<0.000000e+00> : vector<32xf32>
    %19 = vector.multi_reduction <add>, %18, %cst_14 [1] : vector<32x256xf32> to vector<32xf32>
    %20 = vector.shape_cast %19 : vector<32xf32> to vector<32x1xf32>
    %c0_15 = arith.constant 0 : index
    %c0_16 = arith.constant 0 : index
    %21 = vector.load %arg7[%c0_15, %c0_16] : memref<1x1xf32, #tpu.memory_space<vmem>>, vector<1x1xf32>
    %22 = vector.broadcast %21 : vector<1x1xf32> to vector<32x1xf32>
    %23 = arith.addf %20, %22 : vector<32x1xf32>
    %24 = vector.shape_cast %23 : vector<32x1xf32> to vector<32x1xf32>
    %25 = vector.broadcast %24 : vector<32x1xf32> to vector<32x128xf32>
    %c0_17 = arith.constant 0 : index
    %c0_18 = arith.constant 0 : index
    %26 = vector.load %arg8[%c0_17, %c0_18] : memref<32x128xf32, #tpu.memory_space<vmem>>, vector<32x128xf32>
    tpu.vector_store %arg8[%c0_17, %c0_18], %25 {strides = array<i32>} : memref<32x128xf32, #tpu.memory_space<vmem>>, vector<32x128xf32>,
    return
  }
  func.func @transform_0(%arg0: i32) -> (i32, i32) {
    %c0_i32 = arith.constant 0 : i32
    %c0_i32_0 = arith.constant 0 : i32
    return %arg0, %c0_i32 : i32, i32
  }
  func.func @transform_1(%arg0: i32) -> (i32, i32) {
    %c0_i32 = arith.constant 0 : i32
    %c0_i32_0 = arith.constant 0 : i32
    %c0_i32_1 = arith.constant 0 : i32
    return %c0_i32, %c0_i32_0 : i32, i32
  }
  func.func @transform_2(%arg0: i32) -> (i32, i32) {
    %c0_i32 = arith.constant 0 : i32
    %c0_i32_0 = arith.constant 0 : i32
    %c0_i32_1 = arith.constant 0 : i32
    return %c0_i32, %c0_i32_0 : i32, i32
  }
  func.func @transform_3(%arg0: i32) -> (i32, i32) {
    %c0_i32 = arith.constant 0 : i32
    %c0_i32_0 = arith.constant 0 : i32
    %c0_i32_1 = arith.constant 0 : i32
    return %c0_i32, %c0_i32_0 : i32, i32
  }
  func.func @transform_4(%arg0: i32) -> (i32, i32) {
    %c0_i32 = arith.constant 0 : i32
    %c0_i32_0 = arith.constant 0 : i32
    %c0_i32_1 = arith.constant 0 : i32
    return %c0_i32, %c0_i32_0 : i32, i32
  }
  func.func @transform_5(%arg0: i32) -> (i32, i32) {
    %c0_i32 = arith.constant 0 : i32
    %c0_i32_0 = arith.constant 0 : i32
    %c0_i32_1 = arith.constant 0 : i32
    return %c0_i32, %c0_i32_0 : i32, i32
  }
  func.func @transform_6(%arg0: i32) -> (i32, i32) {
    %c0_i32 = arith.constant 0 : i32
    %c0_i32_0 = arith.constant 0 : i32
    %c0_i32_1 = arith.constant 0 : i32
    return %c0_i32, %c0_i32_0 : i32, i32
  }
  func.func @transform_7(%arg0: i32) -> (i32, i32) {
    %c0_i32 = arith.constant 0 : i32
    %c0_i32_0 = arith.constant 0 : i32
    return %arg0, %c0_i32 : i32, i32
  }
}

</mosaic_0001>

<bundles_post_ra>
// kernel: tpu_custom_call.1
= control target key start
LH: loop header
LB: loop body
LE: loop exit
PB: predicated region body
PF: predicated region fallthrough
CT: control target
= control target key end

     0   :  { %s2576_s0 = inlined_call_operand.vmem [shape: bf16[32,16], index: 0, kind: input, shape index: {}]   ;;  %s2577_s1 = inlined_call_operand.hbm [shape: bf16[16,1024], index: 1, kind: input, shape index: {}]   ;;  %s2578_s2 = inlined_call_operand.vmem [shape: f32[1,1024], index: 2, kind: input, shape index: {}]   ;;  %s2579_s3 = inlined_call_operand.hbm [shape: bf16[1024,256], index: 3, kind: input, shape index: {}]   ;;  %s2580_s4 = inlined_call_operand.vmem [shape: f32[1,256], index: 4, kind: input, shape index: {}]   ;;  %s2581_s5 = inlined_call_operand.vmem [shape: f32[1,256], index: 5, kind: input, shape index: {}]   ;;  %s2582_s6 = inlined_call_operand.<no memory space> [shape: f32[1,1], index: 6, kind: input, shape index: {}]   ;;  %s2583_s7 = inlined_call_operand.hbm [shape: f32[32,128], index: 7, kind: output, shape index: {}]  }
   0x1   :  { %v12_v0 = vstv %s2582_s6 }
   0x2   :  { %13 = vst [vmem:[#allocation2] sm:$0x1] %v12_v0 }
   0x3   :  { %14 = vsyncpa [#allocation4], 0 }
   0x4   :  { %15 = vsyncpa [#allocation7], 0 }
   0x5   :  { %16 = vsyncpa [#allocation5], 0  ;;  %s23_s28 = sshll.u32 %s2577_s1, 4  ;;  %s2309_s29 = smov [#allocation3]   ;;  %s24_s28 = int_to_ptr.hbm [resolvable:$true] %s23_s28 }
   0x6   :  { %s25_s30 = sshll.u32 %s2309_s29, 4  ;;  %s38_s10 = sshll.u32 %s2579_s3, 4  ;;  %s26_s30 = int_to_ptr.vmem [resolvable:$true] %s25_s30  ;;  %s39_s10 = int_to_ptr.hbm [resolvable:$true] %s38_s10 }
   0x7   :  { %s2310_s11 = smov 512   ;;  %s2311_s12 = smov 32  }
   0x8   :  { %31 = dma.hbm_to_vmem [thread:$0]  %s24_s28, 1024, %s26_s30, [#allocation4], %s2310_s11, %s2310_s11, %s2311_s12  }
   0x9   :  { %s2312_s6 = smov [#allocation6]   ;;  %s2313_s14 = smov 128  }
   0xa   :  { %s40_s13 = sshll.u32 %s2312_s6, 4  ;;  %s2314_s15 = smov 8   ;;  %s41_s13 = int_to_ptr.vmem [resolvable:$true] %s40_s13 }
   0xb   :  { %46 = dma.hbm_to_vmem [thread:$0]  %s39_s10, 16384, %s41_s13, [#allocation7], %s2313_s14, %s2313_s14, %s2314_s15  }
   0xc   :  { %2303 = dma.done.wait [#allocation4], 1024  }
   0xd   :  { %2304 = vsyncadd [#allocation4], 4294966272 }
   0xe   :  { %2305 = dma.done.wait [#allocation7], 16384  }
   0xf   :  { %2306 = vsyncadd [#allocation7], 4294950912  ;;  %v1523_v1 = vld [vmem:[#allocation3] sm:$0xf]  ;;  %v2083_v3 = vld [vmem:[#allocation3 + $0x4] sm:$0xf] }
  0x10   :  { %v2087_v2 = vld [vmem:[#allocation3 + $0x1c] sm:$0xf0]  ;;  %v1525_v5 = vld [vmem:[#allocation3 + $0x20] sm:$0xf0]  ;;  %v1531_v6 = vld [vmem:[#allocation3 + $0x8] sm:$0xf] }
  0x11   :  { %v1524_v4 = vor.u32 %v2087_v2, %v1523_v1  ;;  %v2088_v7 = vld [vmem:[#allocation3 + $0x24] sm:$0xf0]  ;;  %v1528_v8 = vor.u32 %v2083_v3, %v1525_v5  ;;  %v2084_v10 = vld [vmem:[#allocation3 + $0xc] sm:$0xf]  ;;  %v2372_v12 = vld [vmem:[%s2576_s0] sm:$0xff]  ;;  %vm142_vm0 = vcmask 130048  }
  0x12   :  { %v1532_v9 = vor.u32 %v2088_v7, %v1531_v6  ;;  %v1533_v11 = vld [vmem:[#allocation3 + $0x28] sm:$0xf0]  ;;  %v1547_v14 = vld [vmem:[#allocation3 + $0x18] sm:$0xf]  ;;  %v2086_v16 = vld [vmem:[#allocation3 + $0x1c] sm:$0xf] }
  0x13   :  { %156 = vmatpush.bf16.msra.mxu0 %v1524_v4  ;;  %v1536_v13 = vor.u32 %v2084_v10, %v1533_v11  ;;  %v2090_v15 = vld [vmem:[#allocation3 + $0x34] sm:$0xf0]  ;;  %175 = vmatpush.bf16.msra.mxu1 %v1528_v8  ;;  %v1549_v18 = vld [vmem:[#allocation3 + $0x38] sm:$0xf0]  ;;  %v1539_v19 = vld [vmem:[#allocation3 + $0x10] sm:$0xf] }
  0x14   :  { %194 = vmatpush.bf16.msra.mxu2 %v1532_v9  ;;  %v1548_v17 = vor.u32 %v2090_v15, %v1547_v14  ;;  %v2089_v20 = vld [vmem:[#allocation3 + $0x2c] sm:$0xf0]  ;;  %v1552_v21 = vor.u32 %v2086_v16, %v1549_v18  ;;  %v2085_v23 = vld [vmem:[#allocation3 + $0x14] sm:$0xf]  ;;  %v2385_v26 = vld [vmem:[%s2576_s0 + $0x8] sm:$0xff]  ;;  %s1499_s24 = sshll.u32 %s2583_s7, 4  ;;  %s1500_s24 = int_to_ptr.hbm [resolvable:$true] %s1499_s24 }
  0x15   :  { %213 = vmatpush.bf16.msra.mxu3 %v1536_v13  ;;  %v1540_v22 = vor.u32 %v2089_v20, %v1539_v19  ;;  %v1541_v24 = vld [vmem:[#allocation3 + $0x30] sm:$0xf0]  ;;  %v1627_v27 = vld [vmem:[#allocation6 + $0x70] sm:$0xf]  ;;  %v2106_v28 = vld [vmem:[#allocation6 + $0x74] sm:$0xf0] }
  0x16   :  { %1553 = vmatmul.msk.bf16.vlgmr.msra.gmra.mxu0 %vm142_vm0, %v2372_v12  ;;  %v1544_v25 = vor.u32 %v2085_v23, %v1541_v24  ;;  %1555 = vmatmul.msk.bf16.vlgmr.msra.gmra.mxu1 %vm142_vm0, %v2372_v12  ;;  %v1691_v29 = vld [vmem:[#allocation6 + $0xf0] sm:$0xf]  ;;  %v1628_v30 = vor.u32 %v2106_v28, %v1627_v27  ;;  %v2122_v31 = vld [vmem:[#allocation6 + $0xf4] sm:$0xf0]  ;;  %v1619_v32 = vld [vmem:[#allocation6 + $0x60] sm:$0xf] }
  0x17   :  { %1557 = vmatmul.msk.bf16.vlgmr.msra.gmra.mxu2 %vm142_vm0, %v2372_v12  ;;  %232 = vmatpush.bf16.msrb.mxu0 %v1540_v22  ;;  %v2104_v33 = vld [vmem:[#allocation6 + $0x64] sm:$0xf0]  ;;  %v1692_v34 = vor.u32 %v2122_v31, %v1691_v29  ;;  %v1683_v35 = vld [vmem:[#allocation6 + $0xe0] sm:$0xf]  ;;  %v1755_v37 = vld [vmem:[#allocation6 + $0x170] sm:$0xf] }
  0x18   :  { %270 = vmatpush.bf16.msrb.mxu2 %v1548_v17  ;;  %1559 = vmatmul.msk.bf16.vlgmr.msra.gmra.mxu3 %vm142_vm0, %v2372_v12  ;;  %v2120_v36 = vld [vmem:[#allocation6 + $0xe4] sm:$0xf0]  ;;  %v1620_v38 = vor.u32 %v2104_v33, %v1619_v32  ;;  %v2138_v39 = vld [vmem:[#allocation6 + $0x174] sm:$0xf0]  ;;  %v1819_v40 = vld [vmem:[#allocation6 + $0x1f0] sm:$0xf] }
  0x19   :  { %289 = vmatpush.bf16.msrb.mxu3 %v1552_v21  ;;  %251 = vmatpush.bf16.msrb.mxu1 %v1544_v25  ;;  %v2154_v41 = vld [vmem:[#allocation6 + $0x1f4] sm:$0xf0]  ;;  %v1684_v42 = vor.u32 %v2120_v36, %v1683_v35  ;;  %v1756_v43 = vor.u32 %v2138_v39, %v1755_v37  ;;  %v1611_v45 = vld [vmem:[#allocation6 + $0x50] sm:$0xf]  ;;  %v1747_v49 = vld [vmem:[#allocation6 + $0x160] sm:$0xf] }
  0x1a   :  { %v1820_v44 = vor.u32 %v2154_v41, %v1819_v40  ;;  %v2102_v46 = vld [vmem:[#allocation6 + $0x54] sm:$0xf0]  ;;  %v1675_v47 = vld [vmem:[#allocation6 + $0xd0] sm:$0xf]  ;;  %v2136_v50 = vld [vmem:[#allocation6 + $0x164] sm:$0xf0] }
  0x1b   :  { %1123 = vmatpush.bf16.msra.mxu0 %v1628_v30  ;;  %v2118_v48 = vld [vmem:[#allocation6 + $0xd4] sm:$0xf0]  ;;  %v1748_v51 = vor.u32 %v2136_v50, %v1747_v49  ;;  %v1811_v52 = vld [vmem:[#allocation6 + $0x1e0] sm:$0xf]  ;;  %v2152_v53 = vld [vmem:[#allocation6 + $0x1e4] sm:$0xf0]  ;;  %v1612_v54 = vor.u32 %v2102_v46, %v1611_v45 }
  0x1c   :  { %1161 = vmatpush.bf16.msra.mxu2 %v1756_v43  ;;  %v1812_v55 = vor.u32 %v2152_v53, %v1811_v52  ;;  %v1676_v56 = vor.u32 %v2118_v48, %v1675_v47  ;;  %v1739_v57 = vld [vmem:[#allocation6 + $0x150] sm:$0xf]  ;;  %v2134_v58 = vld [vmem:[#allocation6 + $0x154] sm:$0xf0]  ;;  %v1603_v59 = vld [vmem:[#allocation6 + $0x40] sm:$0xf] }
  0x1d   :  { %1142 = vmatpush.bf16.msra.mxu1 %v1692_v34  ;;  %1180 = vmatpush.bf16.msra.mxu3 %v1820_v44  ;;  %v2100_v60 = vld [vmem:[#allocation6 + $0x44] sm:$0xf0]  ;;  %v1667_v61 = vld [vmem:[#allocation6 + $0xc0] sm:$0xf]  ;;  %v1740_v63 = vor.u32 %v2134_v58, %v1739_v57  ;;  %v1803_v0 = vld [vmem:[#allocation6 + $0x1d0] sm:$0xf] }
  0x1e   :  { %v2116_v62 = vld [vmem:[#allocation6 + $0xc4] sm:$0xf0]  ;;  %v2150_v1 = vld [vmem:[#allocation6 + $0x1d4] sm:$0xf0]  ;;  %v1604_v2 = vor.u32 %v2100_v60, %v1603_v59  ;;  %v1595_v5 = vld [vmem:[#allocation6 + $0x30] sm:$0xf] }
  0x1f   :  { %1124 = vmatpush.bf16.msra.mxu0 %v1620_v38  ;;  %v1668_v3 = vor.u32 %v2116_v62, %v1667_v61  ;;  %v1804_v4 = vor.u32 %v2150_v1, %v1803_v0  ;;  %v2098_v6 = vld [vmem:[#allocation6 + $0x34] sm:$0xf0]  ;;  %v1659_v7 = vld [vmem:[#allocation6 + $0xb0] sm:$0xf]  ;;  %v1731_v11 = vld [vmem:[#allocation6 + $0x140] sm:$0xf] }
  0x20   :  { %1162 = vmatpush.bf16.msra.mxu2 %v1748_v51  ;;  %v1596_v8 = vor.u32 %v2098_v6, %v1595_v5  ;;  %v2114_v9 = vld [vmem:[#allocation6 + $0xb4] sm:$0xf0]  ;;  %v1795_v13 = vld [vmem:[#allocation6 + $0x1c0] sm:$0xf]  ;;  %v2148_v15 = vld [vmem:[#allocation6 + $0x1c4] sm:$0xf0] }
  0x21   :  { %1143 = vmatpush.bf16.msra.mxu1 %v1684_v42  ;;  %1181 = vmatpush.bf16.msra.mxu3 %v1812_v55  ;;  %v1660_v10 = vor.u32 %v2114_v9, %v1659_v7  ;;  %v1796_v16 = vor.u32 %v2148_v15, %v1795_v13  ;;  %v1587_v17 = vld [vmem:[#allocation6 + $0x20] sm:$0xf]  ;;  %v2096_v18 = vld [vmem:[#allocation6 + $0x24] sm:$0xf0]  ;;  %v1723_v22 = vld [vmem:[#allocation6 + $0x130] sm:$0xf] }
  0x22   :  { %v1588_v19 = vor.u32 %v2096_v18, %v1587_v17  ;;  %v1651_v20 = vld [vmem:[#allocation6 + $0xa0] sm:$0xf]  ;;  %v2112_v21 = vld [vmem:[#allocation6 + $0xa4] sm:$0xf0]  ;;  %v2130_v24 = vld [vmem:[#allocation6 + $0x134] sm:$0xf0] }
  0x23   :  { %1125 = vmatpush.bf16.msra.mxu0 %v1612_v54  ;;  %v1652_v23 = vor.u32 %v2112_v21, %v1651_v20  ;;  %v1787_v25 = vld [vmem:[#allocation6 + $0x1b0] sm:$0xf]  ;;  %v2146_v27 = vld [vmem:[#allocation6 + $0x1b4] sm:$0xf0]  ;;  %v1715_v35 = vld [vmem:[#allocation6 + $0x120] sm:$0xf] }
  0x24   :  { %1163 = vmatpush.bf16.msra.mxu2 %v1740_v63  ;;  %v1788_v28 = vor.u32 %v2146_v27, %v1787_v25  ;;  %v1579_v29 = vld [vmem:[#allocation6 + $0x10] sm:$0xf]  ;;  %v2094_v30 = vld [vmem:[#allocation6 + $0x14] sm:$0xf0]  ;;  %v2128_v36 = vld [vmem:[#allocation6 + $0x124] sm:$0xf0] }
  0x25   :  { %1144 = vmatpush.bf16.msra.mxu1 %v1676_v56  ;;  %1182 = vmatpush.bf16.msra.mxu3 %v1804_v4  ;;  %v1643_v31 = vld [vmem:[#allocation6 + $0x90] sm:$0xf]  ;;  %v1580_v32 = vor.u32 %v2094_v30, %v1579_v29  ;;  %v2110_v33 = vld [vmem:[#allocation6 + $0x94] sm:$0xf0]  ;;  %v1716_v37 = vor.u32 %v2128_v36, %v1715_v35  ;;  %v1779_v38 = vld [vmem:[#allocation6 + $0x1a0] sm:$0xf] }
  0x26   :  { %1554 = vmatmul.msk.bf16.gmra.mxu0 %vm142_vm0, %v2385_v26  ;;  %1556 = vmatmul.msk.bf16.gmra.mxu1 %vm142_vm0, %v2385_v26  ;;  %v1644_v34 = vor.u32 %v2110_v33, %v1643_v31  ;;  %v2144_v39 = vld [vmem:[#allocation6 + $0x1a4] sm:$0xf0]  ;;  %v1571_v41 = vld [vmem:[#allocation6] sm:$0xf]  ;;  %v1707_v47 = vld [vmem:[#allocation6 + $0x110] sm:$0xf] }
  0x27   :  { %1558 = vmatmul.msk.bf16.gmra.mxu2 %vm142_vm0, %v2385_v26  ;;  %1126 = vmatpush.bf16.msra.mxu0 %v1604_v2  ;;  %v1780_v40 = vor.u32 %v2144_v39, %v1779_v38  ;;  %v2092_v42 = vld [vmem:[#allocation6 + $0x4] sm:$0xf0]  ;;  %v1635_v43 = vld [vmem:[#allocation6 + $0x80] sm:$0xf]  ;;  %v2126_v48 = vld [vmem:[#allocation6 + $0x114] sm:$0xf0] }
  0x28   :  { %1560 = vmatmul.msk.bf16.gmra.mxu3 %vm142_vm0, %v2385_v26  ;;  %v1572_v44 = vor.u32 %v2092_v42, %v1571_v41  ;;  %v2108_v45 = vld [vmem:[#allocation6 + $0x84] sm:$0xf0]  ;;  %v1771_v49 = vld [vmem:[#allocation6 + $0x190] sm:$0xf]  ;;  %v1708_v50 = vor.u32 %v2126_v48, %v1707_v47  ;;  %v2142_v51 = vld [vmem:[#allocation6 + $0x194] sm:$0xf0] }
  0x29   :  { %1145 = vmatpush.bf16.msra.mxu1 %v1668_v3  ;;  %1183 = vmatpush.bf16.msra.mxu3 %v1796_v16  ;;  %v1636_v46 = vor.u32 %v2108_v45, %v1635_v43  ;;  %v1772_v52 = vor.u32 %v2142_v51, %v1771_v49  ;;  %v1883_v53 = vld [vmem:[#allocation6 + $0x270] sm:$0xf]  ;;  %v2170_v54 = vld [vmem:[#allocation6 + $0x274] sm:$0xf0]  ;;  %v1699_v59 = vld [vmem:[#allocation6 + $0x100] sm:$0xf] }
  0x2a   :  { %v1947_v55 = vld [vmem:[#allocation6 + $0x2f0] sm:$0xf]  ;;  %v1884_v56 = vor.u32 %v2170_v54, %v1883_v53  ;;  %v2186_v57 = vld [vmem:[#allocation6 + $0x2f4] sm:$0xf0]  ;;  %v2124_v60 = vld [vmem:[#allocation6 + $0x104] sm:$0xf0] }
  0x2b   :  { %1127 = vmatpush.bf16.msra.mxu0 %v1596_v8  ;;  %v1948_v58 = vor.u32 %v2186_v57, %v1947_v55  ;;  %v1763_v61 = vld [vmem:[#allocation6 + $0x180] sm:$0xf]  ;;  %v1700_v62 = vor.u32 %v2124_v60, %v1699_v59  ;;  %v2140_v63 = vld [vmem:[#allocation6 + $0x184] sm:$0xf0]  ;;  %v2011_v7 = vld [vmem:[#allocation6 + $0x370] sm:$0xf] }
  0x2c   :  { %v1764_v0 = vor.u32 %v2140_v63, %v1763_v61  ;;  %v1875_v1 = vld [vmem:[#allocation6 + $0x260] sm:$0xf]  ;;  %v2168_v2 = vld [vmem:[#allocation6 + $0x264] sm:$0xf0]  ;;  %v2202_v8 = vld [vmem:[#allocation6 + $0x374] sm:$0xf0] }
  0x2d   :  { %1146 = vmatpush.bf16.msra.mxu1 %v1660_v10  ;;  %1184 = vmatpush.bf16.msra.mxu3 %v1788_v28  ;;  %v1939_v3 = vld [vmem:[#allocation6 + $0x2e0] sm:$0xf]  ;;  %v1876_v4 = vor.u32 %v2168_v2, %v1875_v1  ;;  %v2184_v5 = vld [vmem:[#allocation6 + $0x2e4] sm:$0xf0]  ;;  %v2075_v9 = vld [vmem:[#allocation6 + $0x3f0] sm:$0xf]  ;;  %v2012_v10 = vor.u32 %v2202_v8, %v2011_v7 }
  0x2e   :  { %v1940_v6 = vor.u32 %v2184_v5, %v1939_v3  ;;  %v1867_v13 = vld [vmem:[#allocation6 + $0x250] sm:$0xf]  ;;  %v2182_v17 = vld [vmem:[#allocation6 + $0x2d4] sm:$0xf0]  ;;  %v2200_v20 = vld [vmem:[#allocation6 + $0x364] sm:$0xf0] }
  0x2f   :  { %1128 = vmatpush.bf16.msra.mxu0 %v1588_v19  ;;  %v1931_v15 = vld [vmem:[#allocation6 + $0x2d0] sm:$0xf]  ;;  %v2003_v19 = vld [vmem:[#allocation6 + $0x360] sm:$0xf]  ;;  %v2180_v29 = vld [vmem:[#allocation6 + $0x2c4] sm:$0xf0] }
  0x30   :  { %v1932_v18 = vor.u32 %v2182_v17, %v1931_v15  ;;  %v2067_v21 = vld [vmem:[#allocation6 + $0x3e0] sm:$0xf]  ;;  %v1995_v30 = vld [vmem:[#allocation6 + $0x350] sm:$0xf]  ;;  %v2198_v31 = vld [vmem:[#allocation6 + $0x354] sm:$0xf0] }
  0x31   :  { %1147 = vmatpush.bf16.msra.mxu1 %v1652_v23  ;;  %1185 = vmatpush.bf16.msra.mxu3 %v1780_v40  ;;  %v2216_v23 = vld [vmem:[#allocation6 + $0x3e4] sm:$0xf0]  ;;  %v1859_v25 = vld [vmem:[#allocation6 + $0x240] sm:$0xf]  ;;  %v1996_v33 = vor.u32 %v2198_v31, %v1995_v30  ;;  %v2214_v35 = vld [vmem:[#allocation6 + $0x3d4] sm:$0xf0] }
  0x32   :  { %v1923_v27 = vld [vmem:[#allocation6 + $0x2c0] sm:$0xf]  ;;  %v1851_v38 = vld [vmem:[#allocation6 + $0x230] sm:$0xf]  ;;  %v2162_v39 = vld [vmem:[#allocation6 + $0x234] sm:$0xf0] }
  0x33   :  { %1129 = vmatpush.bf16.msra.mxu0 %v1580_v32  ;;  %v1924_v32 = vor.u32 %v2180_v29, %v1923_v27  ;;  %v2414_v36 = vld [vmem:[%s2578_s2] sm:$0xff]  ;;  %v1915_v40 = vld [vmem:[#allocation6 + $0x2b0] sm:$0xf]  ;;  %v1852_v43 = vor.u32 %v2162_v39, %v1851_v38  ;;  %v2196_v48 = vld [vmem:[#allocation6 + $0x344] sm:$0xf0] }
  0x34   :  { %v2417_v41 = vperm.slane %v2414_v36, 0  ;;  %v1987_v47 = vld [vmem:[#allocation6 + $0x340] sm:$0xf]  ;;  %v2160_v55 = vld [vmem:[#allocation6 + $0x224] sm:$0xf0] }
  0x35   :  { %1148 = vmatpush.bf16.msra.mxu1 %v1644_v34  ;;  %1186 = vmatpush.bf16.msra.mxu3 %v1772_v52  ;;  %v2059_v34 = vld [vmem:[#allocation6 + $0x3d0] sm:$0xf]  ;;  %v2051_v49 = vld [vmem:[#allocation6 + $0x3c0] sm:$0xf]  ;;  %v1988_v51 = vor.u32 %v2196_v48, %v1987_v47  ;;  %v2212_v52 = vld [vmem:[#allocation6 + $0x3c4] sm:$0xf0] }
  0x36   :  { %1561 = vmatmul.msk.bf16.vlgmr.msrb.gmra.mxu0 %vm142_vm0, %v2372_v12  ;;  %1563 = vmatmul.msk.bf16.vlgmr.msrb.gmra.mxu1 %vm142_vm0, %v2372_v12  ;;  %v2052_v53 = vor.u32 %v2212_v52, %v2051_v49  ;;  %v1843_v54 = vld [vmem:[#allocation6 + $0x220] sm:$0xf]  ;;  %v2176_v59 = vld [vmem:[#allocation6 + $0x2a4] sm:$0xf0]  ;;  %v1979_v60 = vld [vmem:[#allocation6 + $0x330] sm:$0xf] }
  0x37   :  { %1565 = vmatmul.msk.bf16.vlgmr.msrb.gmra.mxu2 %vm142_vm0, %v2372_v12  ;;  %1130 = vmatpush.bf16.msra.mxu0 %v1572_v44  ;;  %v2178_v44 = vld [vmem:[#allocation6 + $0x2b4] sm:$0xf0]  ;;  %v2043_v1 = vld [vmem:[#allocation6 + $0x3b0] sm:$0xf]  ;;  %v2192_v17 = vld [vmem:[#allocation6 + $0x324] sm:$0xf0] }
  0x38   :  { %1567 = vmatmul.msk.bf16.vlgmr.msrb.gmra.mxu3 %vm142_vm0, %v2372_v12  ;;  %v2132_v12 = vld [vmem:[#allocation6 + $0x144] sm:$0xf0]  ;;  %v2194_v61 = vld [vmem:[#allocation6 + $0x334] sm:$0xf0]  ;;  %v1835_v5 = vld [vmem:[#allocation6 + $0x210] sm:$0xf] }
  0x39   :  { %v1732_v14 = vor.u32 %v2132_v12, %v1731_v11  ;;  %1149 = vmatpush.bf16.msra.mxu1 %v1636_v46  ;;  %1187 = vmatpush.bf16.msra.mxu3 %v1764_v0  ;;  %v2218_v11 = vld [vmem:[#allocation6 + $0x3f4] sm:$0xf0]  ;;  %v1916_v46 = vor.u32 %v2178_v44, %v1915_v40  ;;  %v1980_v0 = vor.u32 %v2194_v61, %v1979_v60  ;;  %v1827_v27 = vld [vmem:[#allocation6 + $0x200] sm:$0xf]  ;;  %v2027_v38 = vld [vmem:[#allocation6 + $0x390] sm:$0xf] }
  0x3a   :  { %v2076_v12 = vor.u32 %v2218_v11, %v2075_v9  ;;  %v2210_v2 = vld [vmem:[#allocation6 + $0x3b4] sm:$0xf0]  ;;  %v1891_v31 = vld [vmem:[#allocation6 + $0x280] sm:$0xf]  ;;  %v2105_v47 = vld [vmem:[#allocation6 + $0x74] sm:$0xf] }
  0x3b   :  { %1164 = vmatpush.bf16.msra.mxu2 %v1732_v14  ;;  %1199 = vmatpush.bf16.msrb.mxu0 %v1884_v56  ;;  %v2166_v14 = vld [vmem:[#allocation6 + $0x254] sm:$0xf0]  ;;  %v1907_v56 = vld [vmem:[#allocation6 + $0x2a0] sm:$0xf]  ;;  %v1629_v48 = vld [vmem:[#allocation6 + $0x78] sm:$0xf0] }
  0x3c   :  { %v1868_v16 = vor.u32 %v2166_v14, %v1867_v13  ;;  %v1908_v63 = vor.u32 %v2176_v59, %v1907_v56  ;;  %v2174_v11 = vld [vmem:[#allocation6 + $0x294] sm:$0xf0]  ;;  %v2121_v49 = vld [vmem:[#allocation6 + $0xf4] sm:$0xf]  ;;  %v1955_v59 = vld [vmem:[#allocation6 + $0x300] sm:$0xf] }
  0x3d   :  { %1218 = vmatpush.bf16.msrb.mxu1 %v1948_v58  ;;  %1256 = vmatpush.bf16.msrb.mxu3 %v2076_v12  ;;  %v1844_v58 = vor.u32 %v2160_v55, %v1843_v54  ;;  %v1632_v54 = vor.u32 %v2105_v47, %v1629_v48  ;;  %v1693_v55 = vld [vmem:[#allocation6 + $0xf8] sm:$0xf0]  ;;  %v2188_v60 = vld [vmem:[#allocation6 + $0x304] sm:$0xf0]  ;;  %v2019_v61 = vld [vmem:[#allocation6 + $0x380] sm:$0xf] }
  0x3e   :  { %v2099_v48 = vld [vmem:[#allocation6 + $0x44] sm:$0xf] }
  0x3f   :  { %1200 = vmatpush.bf16.msrb.mxu0 %v1876_v4  ;;  %v2044_v4 = vor.u32 %v2210_v2, %v2043_v1  ;;  %v2204_v1 = vld [vmem:[#allocation6 + $0x384] sm:$0xf0] }
  0x41   :  { %1219 = vmatpush.bf16.msrb.mxu1 %v1940_v6  ;;  %v2158_v6 = vld [vmem:[#allocation6 + $0x214] sm:$0xf0] }
  0x42   :  { %v1836_v9 = vor.u32 %v2158_v6, %v1835_v5  ;;  %v2103_v5 = vld [vmem:[#allocation6 + $0x64] sm:$0xf]  ;;  %v1621_v6 = vld [vmem:[#allocation6 + $0x68] sm:$0xf0] }
  0x43   :  { %1201 = vmatpush.bf16.msrb.mxu0 %v1868_v16  ;;  %v1971_v16 = vld [vmem:[#allocation6 + $0x320] sm:$0xf] }
  0x45   :  { %1220 = vmatpush.bf16.msrb.mxu1 %v1932_v18 }
  0x46   :  { %1562 = vmatmul.msk.bf16.gmra.mxu0 %vm142_vm0, %v2385_v26  ;;  %1564 = vmatmul.msk.bf16.gmra.mxu1 %vm142_vm0, %v2385_v26 }
  0x47   :  { %1566 = vmatmul.msk.bf16.gmra.mxu2 %vm142_vm0, %v2385_v26 }
  0x48   :  { %1568 = vmatmul.msk.bf16.gmra.mxu3 %vm142_vm0, %v2385_v26  ;;  %v1724_v26 = vor.u32 %v2130_v24, %v1723_v22  ;;  %v2004_v22 = vor.u32 %v2200_v20, %v2003_v19  ;;  %v2068_v24 = vor.u32 %v2216_v23, %v2067_v21  ;;  %v2426_v19 = vperm.slane %v2414_v36, 2  ;;  %v2208_v23 = vld [vmem:[#allocation6 + $0x3a4] sm:$0xf0] }
  0x49   :  { %1221 = vmatpush.bf16.msrb.mxu1 %v1924_v32  ;;  %v1972_v21 = vor.u32 %v2192_v17, %v1971_v16  ;;  %v2172_v32 = vld [vmem:[#allocation6 + $0x284] sm:$0xf0]  ;;  %v2153_v16 = vld [vmem:[#allocation6 + $0x1f4] sm:$0xf] }
  0x4a   :  { %1165 = vmatpush.bf16.msra.mxu2 %v1724_v26  ;;  %v2164_v26 = vld [vmem:[#allocation6 + $0x244] sm:$0xf0]  ;;  %1257 = vmatpush.bf16.msrb.mxu3 %v2068_v24  ;;  %v2430_v24 = vperm.slane %v2414_v36, 3 }
  0x4b   :  { %v1860_v28 = vor.u32 %v2164_v26, %v1859_v25 }
  0x4d   :  { %1202 = vmatpush.bf16.msrb.mxu0 %v1860_v28  ;;  %1222 = vmatpush.bf16.msrb.mxu1 %v1916_v46  ;;  %v2156_v28 = vld [vmem:[#allocation6 + $0x204] sm:$0xf0] }
  0x4e   :  { %1166 = vmatpush.bf16.msra.mxu2 %v1716_v37  ;;  %v2060_v37 = vor.u32 %v2214_v35, %v2059_v34  ;;  %v1828_v30 = vor.u32 %v2156_v28, %v1827_v27  ;;  %v1892_v34 = vor.u32 %v2172_v32, %v1891_v31  ;;  %v1963_v35 = vld [vmem:[#allocation6 + $0x310] sm:$0xf]  ;;  %v1677_v31 = vld [vmem:[#allocation6 + $0xd8] sm:$0xf0] }
  0x50   :  { %1258 = vmatpush.bf16.msrb.mxu3 %v2060_v37  ;;  %v2190_v37 = vld [vmem:[#allocation6 + $0x314] sm:$0xf0] }
  0x51   :  { %1203 = vmatpush.bf16.msrb.mxu0 %v1852_v43  ;;  %1223 = vmatpush.bf16.msrb.mxu1 %v1908_v63  ;;  %v2206_v43 = vld [vmem:[#allocation6 + $0x394] sm:$0xf0] }
  0x52   :  { %1167 = vmatpush.bf16.msra.mxu2 %v1708_v50  ;;  %v2420_v50 = vperm.slane %v2414_v36, 1  ;;  %v2028_v46 = vor.u32 %v2206_v43, %v2027_v38  ;;  %v1749_v38 = vld [vmem:[#allocation6 + $0x168] sm:$0xf0] }
  0x54   :  { %1259 = vmatpush.bf16.msrb.mxu3 %v2052_v53 }
  0x55   :  { %1204 = vmatpush.bf16.msrb.mxu0 %v1844_v58  ;;  %v1696_v58 = vor.u32 %v2121_v49, %v1693_v55  ;;  %v1605_v49 = vld [vmem:[#allocation6 + $0x48] sm:$0xf0] }
  0x56   :  { %1168 = vmatpush.bf16.msra.mxu2 %v1700_v62 }
  0x58   :  { %1260 = vmatpush.bf16.msrb.mxu3 %v2044_v4  ;;  %v2020_v4 = vor.u32 %v2204_v1, %v2019_v61  ;;  %v2461_v61 = vperm.slane %v2414_v36, 5 }
  0x59   :  { %1205 = vmatpush.bf16.msrb.mxu0 %v1836_v9  ;;  %v1624_v9 = vor.u32 %v2103_v5, %v1621_v6  ;;  %v2113_v5 = vld [vmem:[#allocation6 + $0xb4] sm:$0xf] }
  0x5a   :  { %1237 = vmatpush.bf16.msrb.mxu2 %v2012_v10  ;;  %v1899_v10 = vld [vmem:[#allocation6 + $0x290] sm:$0xf] }
  0x5b   :  { %v1900_v15 = vor.u32 %v2174_v11, %v1899_v10  ;;  %v2119_v10 = vld [vmem:[#allocation6 + $0xe4] sm:$0xf]  ;;  %v1685_v11 = vld [vmem:[#allocation6 + $0xe8] sm:$0xf0] }
  0x5d   :  { %1224 = vmatpush.bf16.msrb.mxu1 %v1900_v15  ;;  %1206 = vmatpush.bf16.msrb.mxu0 %v1828_v30  ;;  %v1757_v15 = vld [vmem:[#allocation6 + $0x178] sm:$0xf0] }
  0x5e   :  { %1238 = vmatpush.bf16.msrb.mxu2 %v2004_v22  ;;  %v2035_v22 = vld [vmem:[#allocation6 + $0x3a0] sm:$0xf] }
  0x5f   :  { %v2036_v26 = vor.u32 %v2208_v23, %v2035_v22  ;;  %v2101_v23 = vld [vmem:[#allocation6 + $0x54] sm:$0xf] }
  0x61   :  { %1261 = vmatpush.bf16.msrb.mxu3 %v2036_v26  ;;  %1225 = vmatpush.bf16.msrb.mxu1 %v1892_v34  ;;  %v2117_v26 = vld [vmem:[#allocation6 + $0xd4] sm:$0xf] }
  0x62   :  { %1239 = vmatpush.bf16.msrb.mxu2 %v1996_v33 }
  0x65   :  { %1262 = vmatpush.bf16.msrb.mxu3 %v2028_v46 }
  0x66   :  { %1240 = vmatpush.bf16.msrb.mxu2 %v1988_v51 }
  0x69   :  { %1263 = vmatpush.bf16.msrb.mxu3 %v2020_v4  ;;  %v1597_v4 = vld [vmem:[#allocation6 + $0x38] sm:$0xf0] }
  0x6a   :  { %1241 = vmatpush.bf16.msrb.mxu2 %v1980_v0  ;;  %v1956_v0 = vor.u32 %v2188_v60, %v1955_v59  ;;  %v2458_v60 = vperm.slane %v2414_v36, 4 }
  0x6e   :  { %1242 = vmatpush.bf16.msrb.mxu2 %v1972_v21 }
  0x93   :  { %v158_v42 = vpop.f32.mrf.mxu0  ;;  %v177_v45 = vpop.f32.mrf.mxu1 }
  0x94   :  { %v159_v57 = vadd.f32 %v158_v42, %v2417_v41  ;;  %v178_v62 = vadd.f32 %v177_v45, %v2420_v50  ;;  %v1964_v42 = vor.u32 %v2190_v37, %v1963_v35  ;;  %v1680_v35 = vor.u32 %v2117_v26, %v1677_v31  ;;  %v2135_v37 = vld [vmem:[#allocation6 + $0x164] sm:$0xf] }
  0x96   :  { %v301_v12 = vmax.f32 %v159_v57, 0.0  ;;  %v302_v18 = vmax.f32 %v178_v62, 0.0  ;;  %1243 = vmatpush.bf16.msrb.mxu2 %v1964_v42 }
  0x9a   :  { %v196_v3 = vpop.f32.mrf.mxu2  ;;  %1244 = vmatpush.bf16.msrb.mxu2 %v1956_v0 }
  0x9b   :  { %v215_v7 = vpop.f32.mrf.mxu3  ;;  %v160_v8 = vpop.f32.mrf.mxu0  ;;  %v197_v39 = vadd.f32 %v196_v3, %v2426_v19 }
  0x9c   :  { %v161_v13 = vadd.f32 %v160_v8, %v2417_v41  ;;  %v179_v14 = vpop.f32.mrf.mxu1  ;;  %v216_v44 = vadd.f32 %v215_v7, %v2430_v24 }
  0x9d   :  { %v180_v20 = vadd.f32 %v179_v14, %v2420_v50  ;;  %v303_v62 = vmax.f32 %v197_v39, 0.0  ;;  %v2137_v14 = vld [vmem:[#allocation6 + $0x174] sm:$0xf]  ;;  %v2151_v39 = vld [vmem:[#allocation6 + $0x1e4] sm:$0xf] }
  0x9e   :  { %v309_v25 = vmax.f32 %v161_v13, 0.0  ;;  %v304_v2 = vmax.f32 %v216_v44, 0.0  ;;  %v1688_v13 = vor.u32 %v2119_v10, %v1685_v11  ;;  %v1752_v44 = vor.u32 %v2135_v37, %v1749_v38  ;;  %v2129_v38 = vld [vmem:[#allocation6 + $0x134] sm:$0xf] }
  0x9f   :  { %v310_v29 = vmax.f32 %v180_v20, 0.0  ;;  %v1821_v20 = vld [vmem:[#allocation6 + $0x1f8] sm:$0xf0] }
  0xa0   :  { %v2432_v33 = vpack.c.bf16 %v309_v25, %v301_v12  ;;  %v1824_v22 = vor.u32 %v2153_v16, %v1821_v20  ;;  %v1613_v25 = vld [vmem:[#allocation6 + $0x58] sm:$0xf0]  ;;  %v2147_v20 = vld [vmem:[#allocation6 + $0x1c4] sm:$0xf] }
  0xa1   :  { %v2435_v40 = vpack.c.bf16 %v310_v29, %v302_v18  ;;  %v1760_v18 = vor.u32 %v2137_v14, %v1757_v15  ;;  %v1616_v30 = vor.u32 %v2101_v23, %v1613_v25  ;;  %v1797_v25 = vld [vmem:[#allocation6 + $0x1c8] sm:$0xf0] }
  0xa2   :  { %v198_v45 = vpop.f32.mrf.mxu2  ;;  %1131 = vmatmul.bf16.vlgmr.msra.gmra.mxu0 %v2432_v33 }
  0xa3   :  { %v199_v51 = vadd.f32 %v198_v45, %v2426_v19  ;;  %v217_v52 = vpop.f32.mrf.mxu3  ;;  %1150 = vmatmul.bf16.vlgmr.msra.gmra.mxu1 %v2435_v40  ;;  %v163_v53 = vpop.f32.mrf.mxu0  ;;  %1275 = vmatpush.bf16.msra.mxu0 %v1632_v54  ;;  %v1813_v45 = vld [vmem:[#allocation6 + $0x1e8] sm:$0xf0] }
  0xa4   :  { %v218_v56 = vadd.f32 %v217_v52, %v2430_v24  ;;  %v182_v57 = vpop.f32.mrf.mxu1  ;;  %1294 = vmatpush.bf16.msra.mxu1 %v1696_v58  ;;  %v164_v8 = vadd.f32 %v163_v53, %v2417_v41  ;;  %v1816_v47 = vor.u32 %v2151_v39, %v1813_v45  ;;  %v2115_v53 = vld [vmem:[#allocation6 + $0xc4] sm:$0xf]  ;;  %v1669_v54 = vld [vmem:[#allocation6 + $0xc8] sm:$0xf0]  ;;  %v2149_v58 = vld [vmem:[#allocation6 + $0x1d4] sm:$0xf] }
  0xa5   :  { %v311_v63 = vmax.f32 %v199_v51, 0.0  ;;  %v183_v17 = vadd.f32 %v182_v57, %v2420_v50  ;;  %v1741_v57 = vld [vmem:[#allocation6 + $0x158] sm:$0xf0]  ;;  %v2482_v45 = vperm.slane %v2414_v36, 6 }
  0xa6   :  { %v312_v3 = vmax.f32 %v218_v56, 0.0  ;;  %v317_v27 = vmax.f32 %v164_v8, 0.0  ;;  %v1672_v56 = vor.u32 %v2115_v53, %v1669_v54  ;;  %v1725_v39 = vld [vmem:[#allocation6 + $0x138] sm:$0xf0] }
  0xa7   :  { %v2442_v7 = vpack.c.bf16 %v311_v63, %v303_v62  ;;  %1276 = vmatpush.bf16.msra.mxu0 %v1624_v9  ;;  %v318_v42 = vmax.f32 %v183_v17, 0.0  ;;  %v1805_v63 = vld [vmem:[#allocation6 + $0x1d8] sm:$0xf0]  ;;  %v2131_v17 = vld [vmem:[#allocation6 + $0x144] sm:$0xf] }
  0xa8   :  { %v2445_v12 = vpack.c.bf16 %v312_v3, %v304_v2  ;;  %1295 = vmatpush.bf16.msra.mxu1 %v1688_v13  ;;  %v1808_v2 = vor.u32 %v2149_v58, %v1805_v63  ;;  %v2097_v3 = vld [vmem:[#allocation6 + $0x34] sm:$0xf]  ;;  %v1661_v13 = vld [vmem:[#allocation6 + $0xb8] sm:$0xf0]  ;;  %v1717_v58 = vld [vmem:[#allocation6 + $0x128] sm:$0xf0] }
  0xa9   :  { %1169 = vmatmul.bf16.vlgmr.msra.gmra.mxu2 %v2442_v7  ;;  %v1600_v11 = vor.u32 %v2097_v3, %v1597_v4  ;;  %v1664_v16 = vor.u32 %v2113_v5, %v1661_v13  ;;  %v2091_v3 = vld [vmem:[#allocation6 + $0x4] sm:$0xf] }
  0xaa   :  { %1188 = vmatmul.bf16.vlgmr.msra.gmra.mxu3 %v2445_v12  ;;  %v201_v21 = vpop.f32.mrf.mxu2  ;;  %1313 = vmatpush.bf16.msra.mxu2 %v1760_v18  ;;  %v1733_v18 = vld [vmem:[#allocation6 + $0x148] sm:$0xf0] }
  0xab   :  { %v220_v28 = vpop.f32.mrf.mxu3  ;;  %v165_v29 = vpop.f32.mrf.mxu0  ;;  %1332 = vmatpush.bf16.msra.mxu3 %v1824_v22  ;;  %1277 = vmatpush.bf16.msra.mxu0 %v1616_v30  ;;  %v202_v51 = vadd.f32 %v201_v21, %v2426_v19  ;;  %v1736_v23 = vor.u32 %v2131_v17, %v1733_v18  ;;  %v1709_v18 = vld [vmem:[#allocation6 + $0x118] sm:$0xf0] }
  0xac   :  { %v166_v32 = vadd.f32 %v165_v29, %v2417_v41  ;;  %v184_v34 = vpop.f32.mrf.mxu1  ;;  %1296 = vmatpush.bf16.msra.mxu1 %v1680_v35  ;;  %v1608_v41 = vor.u32 %v2099_v48, %v1605_v49  ;;  %v221_v0 = vadd.f32 %v220_v28, %v2430_v24  ;;  %v2095_v28 = vld [vmem:[#allocation6 + $0x24] sm:$0xf]  ;;  %v1589_v29 = vld [vmem:[#allocation6 + $0x28] sm:$0xf0] }
  0xad   :  { %v185_v43 = vadd.f32 %v184_v34, %v2420_v50  ;;  %v2133_v50 = vld [vmem:[#allocation6 + $0x154] sm:$0xf]  ;;  %v319_v6 = vmax.f32 %v202_v51, 0.0  ;;  %v1592_v31 = vor.u32 %v2095_v28, %v1589_v29  ;;  %v1653_v34 = vld [vmem:[#allocation6 + $0xa8] sm:$0xf0] }
  0xae   :  { %v325_v46 = vmax.f32 %v166_v32, 0.0  ;;  %1314 = vmatpush.bf16.msra.mxu2 %v1752_v44  ;;  %v1744_v62 = vor.u32 %v2133_v50, %v1741_v57  ;;  %v320_v26 = vmax.f32 %v221_v0, 0.0  ;;  %v2111_v32 = vld [vmem:[#allocation6 + $0xa4] sm:$0xf]  ;;  %v2093_v51 = vld [vmem:[#allocation6 + $0x14] sm:$0xf] }
  0xaf   :  { %v326_v52 = vmax.f32 %v185_v43, 0.0  ;;  %1333 = vmatpush.bf16.msra.mxu3 %v1816_v47  ;;  %1278 = vmatpush.bf16.msra.mxu0 %v1608_v41  ;;  %v1656_v37 = vor.u32 %v2111_v32, %v1653_v34  ;;  %v1789_v47 = vld [vmem:[#allocation6 + $0x1b8] sm:$0xf0]  ;;  %v2109_v41 = vld [vmem:[#allocation6 + $0x94] sm:$0xf] }
  0xb0   :  { %v2453_v55 = vpack.c.bf16 %v325_v46, %v317_v27  ;;  %1297 = vmatpush.bf16.msra.mxu1 %v1672_v56  ;;  %v1728_v46 = vor.u32 %v2129_v38, %v1725_v39  ;;  %v1645_v50 = vld [vmem:[#allocation6 + $0x98] sm:$0xf0]  ;;  %v2127_v57 = vld [vmem:[#allocation6 + $0x124] sm:$0xf]  ;;  %v2169_v28 = vld [vmem:[#allocation6 + $0x274] sm:$0xf] }
  0xb1   :  { %v2455_v59 = vpack.c.bf16 %v326_v52, %v318_v42  ;;  %v2145_v42 = vld [vmem:[#allocation6 + $0x1b4] sm:$0xf]  ;;  %v1581_v52 = vld [vmem:[#allocation6 + $0x18] sm:$0xf0]  ;;  %v1648_v0 = vor.u32 %v2109_v41, %v1645_v50  ;;  %v2183_v50 = vld [vmem:[#allocation6 + $0x2e4] sm:$0xf] }
  0xb2   :  { %v203_v1 = vpop.f32.mrf.mxu2  ;;  %1136 = vmatmul.bf16.gmra.mxu0 %v2453_v55  ;;  %1315 = vmatpush.bf16.msra.mxu2 %v1744_v62  ;;  %v1792_v49 = vor.u32 %v2145_v42, %v1789_v47  ;;  %v1584_v56 = vor.u32 %v2093_v51, %v1581_v52  ;;  %v1885_v29 = vld [vmem:[#allocation6 + $0x278] sm:$0xf0]  ;;  %v2123_v42 = vld [vmem:[#allocation6 + $0x104] sm:$0xf] }
  0xb3   :  { %v204_v8 = vadd.f32 %v203_v1, %v2426_v19  ;;  %v222_v9 = vpop.f32.mrf.mxu3  ;;  %1155 = vmatmul.bf16.gmra.mxu1 %v2455_v59  ;;  %v234_v10 = vpop.f32.mrf.mxu0  ;;  %1334 = vmatpush.bf16.msra.mxu3 %v1808_v2  ;;  %v2143_v1 = vld [vmem:[#allocation6 + $0x1a4] sm:$0xf]  ;;  %v1781_v2 = vld [vmem:[#allocation6 + $0x1a8] sm:$0xf0]  ;;  %v1888_v38 = vor.u32 %v2169_v28, %v1885_v29  ;;  %v1949_v39 = vld [vmem:[#allocation6 + $0x2f8] sm:$0xf0] }
  0xb4   :  { %v223_v14 = vadd.f32 %v222_v9, %v2430_v24  ;;  %v253_v15 = vpop.f32.mrf.mxu1  ;;  %v2469_v22 = vadd.f32 %v234_v10, %v2458_v60  ;;  %v1800_v24 = vor.u32 %v2147_v20, %v1797_v25  ;;  %1279 = vmatpush.bf16.msra.mxu0 %v1600_v11  ;;  %1298 = vmatpush.bf16.msra.mxu1 %v1664_v16  ;;  %v1573_v9 = vld [vmem:[#allocation6 + $0x8] sm:$0xf0]  ;;  %v2107_v10 = vld [vmem:[#allocation6 + $0x84] sm:$0xf]  ;;  %v2491_v11 = vperm.slane %v2414_v36, 7 }
  0xb5   :  { %v327_v21 = vmax.f32 %v204_v8, 0.0  ;;  %v2472_v19 = vadd.f32 %v253_v15, %v2461_v61  ;;  %v1784_v8 = vor.u32 %v2143_v1, %v1781_v2  ;;  %v2125_v15 = vld [vmem:[#allocation6 + $0x114] sm:$0xf]  ;;  %v1576_v17 = vor.u32 %v2091_v3, %v1573_v9  ;;  %v2167_v51 = vld [vmem:[#allocation6 + $0x264] sm:$0xf] }
  0xb6   :  { %v328_v27 = vmax.f32 %v223_v14, 0.0  ;;  %1316 = vmatpush.bf16.msra.mxu2 %v1736_v23  ;;  %v305_v43 = vmax.f32 %v2469_v22, 0.0  ;;  %v1637_v14 = vld [vmem:[#allocation6 + $0x88] sm:$0xf0]  ;;  %v2141_v20 = vld [vmem:[#allocation6 + $0x194] sm:$0xf] }
  0xb7   :  { %v2474_v30 = vpack.c.bf16 %v327_v21, %v319_v6  ;;  %v306_v44 = vmax.f32 %v2472_v19, 0.0  ;;  %1335 = vmatpush.bf16.msra.mxu3 %v1800_v24  ;;  %v1720_v6 = vor.u32 %v2127_v57, %v1717_v58  ;;  %v1640_v22 = vor.u32 %v2107_v10, %v1637_v14  ;;  %v1773_v23 = vld [vmem:[#allocation6 + $0x198] sm:$0xf0]  ;;  %v2201_v3 = vld [vmem:[#allocation6 + $0x374] sm:$0xf] }
  0xb8   :  { %v2476_v35 = vpack.c.bf16 %v328_v27, %v320_v26  ;;  %1280 = vmatpush.bf16.msra.mxu0 %v1592_v31  ;;  %1299 = vmatpush.bf16.msra.mxu1 %v1656_v37  ;;  %v1712_v19 = vor.u32 %v2125_v15, %v1709_v18  ;;  %v1776_v36 = vor.u32 %v2141_v20, %v1773_v23  ;;  %v2185_v31 = vld [vmem:[#allocation6 + $0x2f4] sm:$0xf]  ;;  %v2077_v10 = vld [vmem:[#allocation6 + $0x3f8] sm:$0xf0]  ;;  %v2199_v23 = vld [vmem:[#allocation6 + $0x364] sm:$0xf] }
  0xb9   :  { %1174 = vmatmul.bf16.gmra.mxu2 %v2474_v30  ;;  %v1952_v47 = vor.u32 %v2185_v31, %v1949_v39  ;;  %v2165_v15 = vld [vmem:[#allocation6 + $0x254] sm:$0xf]  ;;  %v2215_v29 = vld [vmem:[#allocation6 + $0x3e4] sm:$0xf]  ;;  %v2069_v31 = vld [vmem:[#allocation6 + $0x3e8] sm:$0xf0] }
  0xba   :  { %1193 = vmatmul.bf16.gmra.mxu3 %v2476_v35  ;;  %v272_v48 = vpop.f32.mrf.mxu2  ;;  %1317 = vmatpush.bf16.msra.mxu2 %v1728_v46  ;;  %v1861_v39 = vld [vmem:[#allocation6 + $0x248] sm:$0xf0] }
  0xbb   :  { %v291_v53 = vpop.f32.mrf.mxu3  ;;  %v236_v54 = vpop.f32.mrf.mxu0  ;;  %v2487_v4 = vadd.f32 %v272_v48, %v2482_v45  ;;  %1336 = vmatpush.bf16.msra.mxu3 %v1792_v49  ;;  %v2139_v48 = vld [vmem:[#allocation6 + $0x184] sm:$0xf]  ;;  %v1765_v49 = vld [vmem:[#allocation6 + $0x188] sm:$0xf0] }
  0xbc   :  { %v237_v62 = vadd.f32 %v236_v54, %v2458_v60  ;;  %v255_v63 = vpop.f32.mrf.mxu1  ;;  %1281 = vmatpush.bf16.msra.mxu0 %v1584_v56  ;;  %1300 = vmatpush.bf16.msra.mxu1 %v1648_v0  ;;  %v292_v27 = vadd.f32 %v291_v53, %v2491_v11  ;;  %v1768_v54 = vor.u32 %v2139_v48, %v1765_v49  ;;  %v1877_v56 = vld [vmem:[#allocation6 + $0x268] sm:$0xf0]  ;;  %v1997_v48 = vld [vmem:[#allocation6 + $0x358] sm:$0xf0]  ;;  %v2213_v49 = vld [vmem:[#allocation6 + $0x3d4] sm:$0xf] }
  0xbd   :  { %v256_v5 = vadd.f32 %v255_v63, %v2461_v61  ;;  %v307_v25 = vmax.f32 %v2487_v4, 0.0  ;;  %v1941_v63 = vld [vmem:[#allocation6 + $0x2e8] sm:$0xf0]  ;;  %v2013_v4 = vld [vmem:[#allocation6 + $0x378] sm:$0xf0] }
  0xbe   :  { %v313_v13 = vmax.f32 %v237_v62, 0.0  ;;  %1318 = vmatpush.bf16.msra.mxu2 %v1720_v6  ;;  %v308_v57 = vmax.f32 %v292_v27, 0.0  ;;  %v1880_v62 = vor.u32 %v2167_v51, %v1877_v56  ;;  %v1944_v1 = vor.u32 %v2183_v50, %v1941_v63  ;;  %v2177_v63 = vld [vmem:[#allocation6 + $0x2b4] sm:$0xf] }
  0xbf   :  { %v314_v16 = vmax.f32 %v256_v5, 0.0  ;;  %1337 = vmatpush.bf16.msra.mxu3 %v1784_v8  ;;  %v2217_v5 = vld [vmem:[#allocation6 + $0x3f4] sm:$0xf]  ;;  %v2016_v9 = vor.u32 %v2201_v3, %v2013_v4 }
  0xc0   :  { %v2493_v21 = vpack.c.bf16 %v313_v13, %v305_v43  ;;  %1282 = vmatpush.bf16.msra.mxu0 %v1576_v17  ;;  %v1701_v43 = vld [vmem:[#allocation6 + $0x108] sm:$0xf0]  ;;  %1301 = vmatpush.bf16.msra.mxu1 %v1640_v22  ;;  %v2080_v14 = vor.u32 %v2217_v5, %v2077_v10  ;;  %v2181_v17 = vld [vmem:[#allocation6 + $0x2d4] sm:$0xf]  ;;  %v1917_v5 = vld [vmem:[#allocation6 + $0x2b8] sm:$0xf0] }
  0xc1   :  { %v2496_v26 = vpack.c.bf16 %v314_v16, %v306_v44  ;;  %v1704_v53 = vor.u32 %v2123_v42, %v1701_v43  ;;  %v1869_v16 = vld [vmem:[#allocation6 + $0x258] sm:$0xf0]  ;;  %v2179_v42 = vld [vmem:[#allocation6 + $0x2c4] sm:$0xf]  ;;  %v1920_v10 = vor.u32 %v2177_v63, %v1917_v5 }
  0xc2   :  { %v274_v24 = vpop.f32.mrf.mxu2  ;;  %1207 = vmatmul.bf16.vlgmr.msrb.gmra.mxu0 %v2493_v21  ;;  %1319 = vmatpush.bf16.msra.mxu2 %v1712_v19  ;;  %v1872_v22 = vor.u32 %v2165_v15, %v1869_v16  ;;  %v1933_v19 = vld [vmem:[#allocation6 + $0x2d8] sm:$0xf0]  ;;  %v2053_v15 = vld [vmem:[#allocation6 + $0x3c8] sm:$0xf0]  ;;  %v2159_v16 = vld [vmem:[#allocation6 + $0x224] sm:$0xf] }
  0xc3   :  { %v275_v32 = vadd.f32 %v274_v24, %v2482_v45  ;;  %v293_v34 = vpop.f32.mrf.mxu3  ;;  %1226 = vmatmul.bf16.vlgmr.msrb.gmra.mxu1 %v2496_v26  ;;  %v239_v37 = vpop.f32.mrf.mxu0  ;;  %1338 = vmatpush.bf16.msra.mxu3 %v1776_v36  ;;  %v1936_v24 = vor.u32 %v2181_v17, %v1933_v19 }
  0xc4   :  { %v294_v44 = vadd.f32 %v293_v34, %v2491_v11  ;;  %v258_v46 = vpop.f32.mrf.mxu1  ;;  %v2504_v41 = vadd.f32 %v239_v37, %v2458_v60  ;;  %1351 = vmatpush.bf16.msrb.mxu0 %v1888_v38  ;;  %1370 = vmatpush.bf16.msrb.mxu1 %v1952_v47  ;;  %v2072_v38 = vor.u32 %v2215_v29, %v2069_v31  ;;  %v1981_v29 = vld [vmem:[#allocation6 + $0x338] sm:$0xf0]  ;;  %v2209_v31 = vld [vmem:[#allocation6 + $0x3b4] sm:$0xf] }
  0xc5   :  { %v315_v52 = vmax.f32 %v275_v32, 0.0  ;;  %v259_v8 = vadd.f32 %v258_v46, %v2461_v61  ;;  %v2163_v32 = vld [vmem:[#allocation6 + $0x244] sm:$0xf]  ;;  %v2197_v46 = vld [vmem:[#allocation6 + $0x354] sm:$0xf] }
  0xc6   :  { %v316_v58 = vmax.f32 %v294_v44, 0.0  ;;  %1320 = vmatpush.bf16.msra.mxu2 %v1704_v53  ;;  %v321_v6 = vmax.f32 %v2504_v41, 0.0  ;;  %v1925_v44 = vld [vmem:[#allocation6 + $0x2c8] sm:$0xf0]  ;;  %v2000_v41 = vor.u32 %v2197_v46, %v1997_v48  ;;  %v2061_v53 = vld [vmem:[#allocation6 + $0x3d8] sm:$0xf0] }
  0xc7   :  { %v2506_v0 = vpack.c.bf16 %v315_v52, %v307_v25  ;;  %1339 = vmatpush.bf16.msra.mxu3 %v1768_v54  ;;  %v2005_v25 = vld [vmem:[#allocation6 + $0x368] sm:$0xf0]  ;;  %v322_v34 = vmax.f32 %v259_v8, 0.0  ;;  %v1928_v52 = vor.u32 %v2179_v42, %v1925_v44  ;;  %v2064_v56 = vor.u32 %v2213_v49, %v2061_v53  ;;  %v2173_v42 = vld [vmem:[#allocation6 + $0x294] sm:$0xf] }
  0xc8   :  { %v2508_v2 = vpack.c.bf16 %v316_v58, %v308_v57  ;;  %1352 = vmatpush.bf16.msrb.mxu0 %v1880_v62  ;;  %1371 = vmatpush.bf16.msrb.mxu1 %v1944_v1  ;;  %v2008_v28 = vor.u32 %v2199_v23, %v2005_v25  ;;  %v2161_v58 = vld [vmem:[#allocation6 + $0x234] sm:$0xf]  ;;  %v1853_v62 = vld [vmem:[#allocation6 + $0x238] sm:$0xf0]  ;;  %v1989_v8 = vld [vmem:[#allocation6 + $0x348] sm:$0xf0] }
  0xc9   :  { %1245 = vmatmul.bf16.vlgmr.msrb.gmra.mxu2 %v2506_v0  ;;  %v1856_v4 = vor.u32 %v2161_v58, %v1853_v62  ;;  %v1909_v25 = vld [vmem:[#allocation6 + $0x2a8] sm:$0xf0]  ;;  %v1901_v44 = vld [vmem:[#allocation6 + $0x298] sm:$0xf0]  ;;  %v2191_v46 = vld [vmem:[#allocation6 + $0x324] sm:$0xf] }
  0xca   :  { %1264 = vmatmul.bf16.vlgmr.msrb.gmra.mxu3 %v2508_v2  ;;  %v277_v13 = vpop.f32.mrf.mxu2  ;;  %1389 = vmatpush.bf16.msrb.mxu2 %v2016_v9  ;;  %v2207_v49 = vld [vmem:[#allocation6 + $0x3a4] sm:$0xf]  ;;  %v1965_v58 = vld [vmem:[#allocation6 + $0x318] sm:$0xf0]  ;;  %v2205_v62 = vld [vmem:[#allocation6 + $0x394] sm:$0xf] }
  0xcb   :  { %v296_v18 = vpop.f32.mrf.mxu3  ;;  %v241_v20 = vpop.f32.mrf.mxu0  ;;  %1408 = vmatpush.bf16.msrb.mxu3 %v2080_v14  ;;  %v2211_v14 = vld [vmem:[#allocation6 + $0x3c4] sm:$0xf] }
  0xcc   :  { %v242_v36 = vadd.f32 %v241_v20, %v2458_v60  ;;  %v260_v27 = vpop.f32.mrf.mxu1  ;;  %1353 = vmatpush.bf16.msrb.mxu0 %v1872_v22  ;;  %1372 = vmatpush.bf16.msrb.mxu1 %v1936_v24  ;;  %v1864_v60 = vor.u32 %v2163_v32, %v1861_v39  ;;  %v297_v50 = vadd.f32 %v296_v18, %v2491_v11  ;;  %v1845_v20 = vld [vmem:[#allocation6 + $0x228] sm:$0xf0]  ;;  %v2175_v22 = vld [vmem:[#allocation6 + $0x2a4] sm:$0xf]  ;;  %v1837_v39 = vld [vmem:[#allocation6 + $0x218] sm:$0xf0] }
  0xcd   :  { %v261_v37 = vadd.f32 %v260_v27, %v2461_v61  ;;  %v278_v61 = vadd.f32 %v277_v13, %v2482_v45  ;;  %v1912_v24 = vor.u32 %v2175_v22, %v1909_v25 }
  0xce   :  { %v329_v43 = vmax.f32 %v242_v36, 0.0  ;;  %1390 = vmatpush.bf16.msrb.mxu2 %v2008_v28  ;;  %v324_v19 = vmax.f32 %v297_v50, 0.0  ;;  %v2193_v28 = vld [vmem:[#allocation6 + $0x334] sm:$0xf]  ;;  %v1893_v50 = vld [vmem:[#allocation6 + $0x288] sm:$0xf0] }
  0xcf   :  { %v330_v47 = vmax.f32 %v261_v37, 0.0  ;;  %1409 = vmatpush.bf16.msrb.mxu3 %v2072_v38  ;;  %v323_v17 = vmax.f32 %v278_v61, 0.0  ;;  %v1984_v32 = vor.u32 %v2193_v28, %v1981_v29  ;;  %v2157_v38 = vld [vmem:[#allocation6 + $0x214] sm:$0xf]  ;;  %v1829_v61 = vld [vmem:[#allocation6 + $0x208] sm:$0xf0] }
  0xd0   :  { %v2516_v51 = vpack.c.bf16 %v329_v43, %v321_v6  ;;  %1354 = vmatpush.bf16.msrb.mxu0 %v1864_v60  ;;  %v2195_v6 = vld [vmem:[#allocation6 + $0x344] sm:$0xf]  ;;  %1373 = vmatpush.bf16.msrb.mxu1 %v1928_v52  ;;  %v1840_v43 = vor.u32 %v2157_v38, %v1837_v39  ;;  %v1904_v60 = vor.u32 %v2173_v42, %v1901_v44  ;;  %v2037_v52 = vld [vmem:[#allocation6 + $0x3a8] sm:$0xf0] }
  0xd1   :  { %v2519_v54 = vpack.c.bf16 %v330_v47, %v322_v34  ;;  %v1992_v13 = vor.u32 %v2195_v6, %v1989_v8  ;;  %v2045_v34 = vld [vmem:[#allocation6 + $0x3b8] sm:$0xf0]  ;;  %v1973_v47 = vld [vmem:[#allocation6 + $0x328] sm:$0xf0]  ;;  %v2040_v53 = vor.u32 %v2207_v49, %v2037_v52  ;;  %v2187_v6 = vld [vmem:[#allocation6 + $0x304] sm:$0xf] }
  0xd2   :  { %v279_v57 = vpop.f32.mrf.mxu2  ;;  %1212 = vmatmul.bf16.gmra.mxu0 %v2516_v51  ;;  %1391 = vmatpush.bf16.msrb.mxu2 %v2000_v41  ;;  %v2048_v37 = vor.u32 %v2209_v31, %v2045_v34  ;;  %v1976_v48 = vor.u32 %v2191_v46, %v1973_v47  ;;  %v2155_v41 = vld [vmem:[#allocation6 + $0x204] sm:$0xf]  ;;  %v1957_v8 = vld [vmem:[#allocation6 + $0x308] sm:$0xf0] }
  0xd3   :  { %v280_v1 = vadd.f32 %v279_v57, %v2482_v45  ;;  %v298_v3 = vpop.f32.mrf.mxu3  ;;  %1231 = vmatmul.bf16.gmra.mxu1 %v2519_v54  ;;  %1410 = vmatpush.bf16.msrb.mxu3 %v2064_v56  ;;  %v2056_v45 = vor.u32 %v2211_v14, %v2053_v15  ;;  %v2171_v56 = vld [vmem:[#allocation6 + $0x284] sm:$0xf]  ;;  %v2189_v57 = vld [vmem:[#allocation6 + $0x314] sm:$0xf]  ;;  %v1832_v63 = vor.u32 %v2155_v41, %v1829_v61 }
  0xd4   :  { %v299_v9 = vadd.f32 %v298_v3, %v2491_v11  ;;  %1355 = vmatpush.bf16.msrb.mxu0 %v1856_v4  ;;  %v1848_v11 = vor.u32 %v2159_v16, %v1845_v20  ;;  %1374 = vmatpush.bf16.msrb.mxu1 %v1920_v10  ;;  %v1896_v3 = vor.u32 %v2171_v56, %v1893_v50 }
  0xd5   :  { %v331_v18 = vmax.f32 %v280_v1, 0.0  ;;  %v2029_v1 = vld [vmem:[#allocation6 + $0x398] sm:$0xf0]  ;;  %v1968_v4 = vor.u32 %v2189_v57, %v1965_v58  ;;  %v1960_v10 = vor.u32 %v2187_v6, %v1957_v8 }
  0xd6   :  { %v332_v23 = vmax.f32 %v299_v9, 0.0  ;;  %1392 = vmatpush.bf16.msrb.mxu2 %v1992_v13  ;;  %v2032_v5 = vor.u32 %v2205_v62, %v2029_v1  ;;  %v2203_v9 = vld [vmem:[#allocation6 + $0x384] sm:$0xf]  ;;  %v2021_v13 = vld [vmem:[#allocation6 + $0x388] sm:$0xf0] }
  0xd7   :  { %v2526_v36 = vpack.c.bf16 %v331_v18, %v323_v17  ;;  %1411 = vmatpush.bf16.msrb.mxu3 %v2056_v45  ;;  %v2024_v14 = vor.u32 %v2203_v9, %v2021_v13 }
  0xd8   :  { %v2528_v27 = vpack.c.bf16 %v332_v23, %v324_v19  ;;  %1356 = vmatpush.bf16.msrb.mxu0 %v1848_v11  ;;  %1375 = vmatpush.bf16.msrb.mxu1 %v1912_v24 }
  0xd9   :  { %1250 = vmatmul.bf16.gmra.mxu2 %v2526_v36 }
  0xda   :  { %1269 = vmatmul.bf16.gmra.mxu3 %v2528_v27  ;;  %1393 = vmatpush.bf16.msrb.mxu2 %v1984_v32 }
  0xdb   :  { %1412 = vmatpush.bf16.msrb.mxu3 %v2048_v37 }
  0xdc   :  { %1357 = vmatpush.bf16.msrb.mxu0 %v1840_v43  ;;  %1376 = vmatpush.bf16.msrb.mxu1 %v1904_v60 }
  0xde   :  { %1394 = vmatpush.bf16.msrb.mxu2 %v1976_v48 }
  0xdf   :  { %1413 = vmatpush.bf16.msrb.mxu3 %v2040_v53 }
  0xe0   :  { %1358 = vmatpush.bf16.msrb.mxu0 %v1832_v63  ;;  %1377 = vmatpush.bf16.msrb.mxu1 %v1896_v3 }
  0xe2   :  { %1283 = vmatmul.bf16.vlgmr.msra.gmra.mxu0 %v2432_v33  ;;  %1395 = vmatpush.bf16.msrb.mxu2 %v1968_v4  ;;  %v2550_v33 = vld [vmem:[%s2580_s4] sm:$0x3] }
  0xe3   :  { %1302 = vmatmul.bf16.vlgmr.msra.gmra.mxu1 %v2435_v40  ;;  %1414 = vmatpush.bf16.msrb.mxu3 %v2032_v5  ;;  %v479_v40 = vperm.slane %v2550_v33, 0 }
  0xe6   :  { %1396 = vmatpush.bf16.msrb.mxu2 %v1960_v10 }
  0xe7   :  { %1415 = vmatpush.bf16.msrb.mxu3 %v2024_v14 }
  0xe9   :  { %1321 = vmatmul.bf16.vlgmr.msra.gmra.mxu2 %v2442_v7 }
  0xea   :  { %1340 = vmatmul.bf16.vlgmr.msra.gmra.mxu3 %v2445_v12 }
  0xf2   :  { %1288 = vmatmul.bf16.gmra.mxu0 %v2453_v55 }
  0xf3   :  { %1307 = vmatmul.bf16.gmra.mxu1 %v2455_v59 }
  0xf9   :  { %1326 = vmatmul.bf16.gmra.mxu2 %v2474_v30 }
  0xfa   :  { %1345 = vmatmul.bf16.gmra.mxu3 %v2476_v35 }
 0x102   :  { %1359 = vmatmul.bf16.vlgmr.msrb.gmra.mxu0 %v2493_v21 }
 0x103   :  { %1378 = vmatmul.bf16.vlgmr.msrb.gmra.mxu1 %v2496_v26 }
 0x109   :  { %1397 = vmatmul.bf16.vlgmr.msrb.gmra.mxu2 %v2506_v0 }
 0x10a   :  { %1416 = vmatmul.bf16.vlgmr.msrb.gmra.mxu3 %v2508_v2 }
 0x112   :  { %1364 = vmatmul.bf16.gmra.mxu0 %v2516_v51 }
 0x113   :  { %1383 = vmatmul.bf16.gmra.mxu1 %v2519_v54 }
 0x119   :  { %1402 = vmatmul.bf16.gmra.mxu2 %v2526_v36 }
 0x11a   :  { %1421 = vmatmul.bf16.gmra.mxu3 %v2528_v27 }
 0x11f   :  { %v1132_v7 = vpop.f32.mrf.mxu0 }
 0x120   :  { %v1133_v12 = vadd.f32 %v1132_v7, %v479_v40  ;;  %v1151_v55 = vpop.f32.mrf.mxu1 }
 0x122   :  { %v1152_v59 = vadd.f32 %v1151_v55, %v1133_v12 }
 0x127   :  { %v1134_v30 = vpop.f32.mrf.mxu0 }
 0x128   :  { %v1135_v35 = vadd.f32 %v1134_v30, %v479_v40  ;;  %v1153_v21 = vpop.f32.mrf.mxu1 }
 0x12a   :  { %v1154_v26 = vadd.f32 %v1153_v21, %v1135_v35 }
 0x12c   :  { %v1170_v0 = vpop.f32.mrf.mxu2 }
 0x12d   :  { %v1171_v2 = vadd.f32 %v1170_v0, %v1152_v59  ;;  %v1189_v51 = vpop.f32.mrf.mxu3 }
 0x12f   :  { %v1190_v54 = vadd.f32 %v1189_v51, %v1171_v2  ;;  %v1137_v15 = vpop.f32.mrf.mxu0 }
 0x130   :  { %v1138_v16 = vadd.f32 %v1137_v15, %v479_v40  ;;  %v1156_v17 = vpop.f32.mrf.mxu1 }
 0x132   :  { %v1157_v18 = vadd.f32 %v1156_v17, %v1138_v16 }
 0x134   :  { %v1172_v45 = vpop.f32.mrf.mxu2 }
 0x135   :  { %v1173_v20 = vadd.f32 %v1172_v45, %v1154_v26  ;;  %v1191_v22 = vpop.f32.mrf.mxu3 }
 0x137   :  { %v1192_v19 = vadd.f32 %v1191_v22, %v1173_v20  ;;  %v1139_v23 = vpop.f32.mrf.mxu0 }
 0x138   :  { %v1140_v25 = vadd.f32 %v1139_v23, %v479_v40  ;;  %v1158_v36 = vpop.f32.mrf.mxu1 }
 0x13a   :  { %v1159_v11 = vadd.f32 %v1158_v36, %v1140_v25 }
 0x13c   :  { %v1175_v27 = vpop.f32.mrf.mxu2 }
 0x13d   :  { %v1176_v24 = vadd.f32 %v1175_v27, %v1157_v18  ;;  %v1194_v28 = vpop.f32.mrf.mxu3 }
 0x13f   :  { %v1195_v29 = vadd.f32 %v1194_v28, %v1176_v24  ;;  %v1208_v31 = vpop.f32.mrf.mxu0 }
 0x140   :  { %v1209_v32 = vadd.f32 %v1208_v31, %v1190_v54  ;;  %v1227_v34 = vpop.f32.mrf.mxu1  ;;  %v480_v54 = vperm.slane %v2550_v33, 1  ;;  %v1435_v33 = vld [vmem:[%s2581_s5] sm:$0x3]  ;;  %s2316_s5 = smov [#allocation8]  }
 0x141   :  { %s1497_s21 = sshll.u32 %s2316_s5, 4  ;;  %s1498_s21 = int_to_ptr.vmem [resolvable:$true] %s1497_s21 }
 0x142   :  { %v1228_v37 = vadd.f32 %v1227_v34, %v1209_v32 }
 0x144   :  { %v1177_v38 = vpop.f32.mrf.mxu2 }
 0x145   :  { %v1178_v39 = vadd.f32 %v1177_v38, %v1159_v11  ;;  %v1196_v42 = vpop.f32.mrf.mxu3 }
 0x147   :  { %v1197_v43 = vadd.f32 %v1196_v42, %v1178_v39  ;;  %v1210_v44 = vpop.f32.mrf.mxu0 }
 0x148   :  { %v1211_v46 = vadd.f32 %v1210_v44, %v1192_v19  ;;  %v1229_v47 = vpop.f32.mrf.mxu1  ;;  %v1437_v44 = vperm.slane %v1435_v33, 0 }
 0x14a   :  { %v1230_v60 = vadd.f32 %v1229_v47, %v1211_v46 }
 0x14c   :  { %v1246_v48 = vpop.f32.mrf.mxu2 }
 0x14d   :  { %v1247_v49 = vadd.f32 %v1246_v48, %v1228_v37  ;;  %v1265_v52 = vpop.f32.mrf.mxu3 }
 0x14f   :  { %v2554_v41 = vadd.f32 %v1265_v52, %v1247_v49  ;;  %v1213_v53 = vpop.f32.mrf.mxu0  ;;  %v1438_v49 = vperm.slane %v1435_v33, 1 }
 0x150   :  { %v1214_v61 = vadd.f32 %v1213_v53, %v1195_v29  ;;  %v1232_v56 = vpop.f32.mrf.mxu1 }
 0x152   :  { %v1233_v50 = vadd.f32 %v1232_v56, %v1214_v61 }
 0x154   :  { %v1248_v57 = vpop.f32.mrf.mxu2 }
 0x155   :  { %v1249_v58 = vadd.f32 %v1248_v57, %v1230_v60  ;;  %v1267_v62 = vpop.f32.mrf.mxu3 }
 0x157   :  { %v2556_v63 = vadd.f32 %v1267_v62, %v1249_v58  ;;  %v1215_v1 = vpop.f32.mrf.mxu0 }
 0x158   :  { %v1216_v3 = vadd.f32 %v1215_v1, %v1197_v43  ;;  %v1234_v4 = vpop.f32.mrf.mxu1  ;;  %v1427_v43 = vmax.f32 %v2554_v41, 0.0 }
 0x159   :  { %v1429_v41 = vmax.f32 %v2556_v63, 0.0 }
 0x15a   :  { %v1235_v5 = vadd.f32 %v1234_v4, %v1216_v3  ;;  %v1441_v57 = vmul.f32 %v1437_v44, %v1427_v43 }
 0x15c   :  { %v1251_v6 = vpop.f32.mrf.mxu2 }
 0x15d   :  { %v1252_v8 = vadd.f32 %v1251_v6, %v1233_v50  ;;  %v1270_v9 = vpop.f32.mrf.mxu3 }
 0x15f   :  { %v2558_v10 = vadd.f32 %v1270_v9, %v1252_v8  ;;  %v1284_v13 = vpop.f32.mrf.mxu0 }
 0x160   :  { %v1303_v14 = vpop.f32.mrf.mxu1  ;;  %v1285_v17 = vadd.f32 %v1284_v13, %v480_v54 }
 0x162   :  { %v1304_v20 = vadd.f32 %v1303_v14, %v1285_v17 }
 0x164   :  { %v1253_v40 = vpop.f32.mrf.mxu2 }
 0x165   :  { %v1254_v7 = vadd.f32 %v1253_v40, %v1235_v5  ;;  %v1272_v12 = vpop.f32.mrf.mxu3 }
 0x167   :  { %v2560_v55 = vadd.f32 %v1272_v12, %v1254_v7  ;;  %v1286_v59 = vpop.f32.mrf.mxu0  ;;  %v1443_v7 = vmul.f32 %v1437_v44, %v1429_v41 }
 0x168   :  { %v1305_v30 = vpop.f32.mrf.mxu1  ;;  %v1287_v23 = vadd.f32 %v1286_v59, %v480_v54 }
 0x16a   :  { %v1306_v24 = vadd.f32 %v1305_v30, %v1287_v23 }
 0x16c   :  { %v1322_v35 = vpop.f32.mrf.mxu2 }
 0x16d   :  { %v1341_v21 = vpop.f32.mrf.mxu3  ;;  %v1323_v19 = vadd.f32 %v1322_v35, %v1304_v20 }
 0x16f   :  { %v1289_v26 = vpop.f32.mrf.mxu0  ;;  %v1342_v11 = vadd.f32 %v1341_v21, %v1323_v19 }
 0x170   :  { %v1308_v0 = vpop.f32.mrf.mxu1  ;;  %v1290_v32 = vadd.f32 %v1289_v26, %v480_v54 }
 0x172   :  { %v1309_v47 = vadd.f32 %v1308_v0, %v1290_v32 }
 0x174   :  { %v1324_v2 = vpop.f32.mrf.mxu2 }
 0x175   :  { %v1343_v51 = vpop.f32.mrf.mxu3  ;;  %v1325_v31 = vadd.f32 %v1324_v2, %v1306_v24 }
 0x177   :  { %v1291_v15 = vpop.f32.mrf.mxu0  ;;  %v1344_v38 = vadd.f32 %v1343_v51, %v1325_v31  ;;  %v1431_v51 = vmax.f32 %v2558_v10, 0.0 }
 0x178   :  { %v1310_v16 = vpop.f32.mrf.mxu1  ;;  %v1292_v56 = vadd.f32 %v1291_v15, %v480_v54 }
 0x17a   :  { %v1311_v6 = vadd.f32 %v1310_v16, %v1292_v56 }
 0x17c   :  { %v1327_v18 = vpop.f32.mrf.mxu2 }
 0x17d   :  { %v1346_v45 = vpop.f32.mrf.mxu3  ;;  %v1328_v52 = vadd.f32 %v1327_v18, %v1309_v47  ;;  %v1445_v18 = vmul.f32 %v1437_v44, %v1431_v51 }
 0x17f   :  { %v1360_v22 = vpop.f32.mrf.mxu0  ;;  %v1347_v1 = vadd.f32 %v1346_v45, %v1328_v52 }
 0x180   :  { %v1379_v25 = vpop.f32.mrf.mxu1  ;;  %v1361_v28 = vadd.f32 %v1360_v22, %v1342_v11 }
 0x182   :  { %v1380_v34 = vadd.f32 %v1379_v25, %v1361_v28  ;;  %v1433_v25 = vmax.f32 %v2560_v55, 0.0  ;;  %v2315_v28 = vmov 0  }
 0x183   :  { %2227 = vset.pattern.permute.xlu2 %v2315_v28  ;;  %2228 = vset.pattern.permute.xlu0 %v2315_v28 }
 0x184   :  { %v1329_v36 = vpop.f32.mrf.mxu2  ;;  %2229 = vset.pattern.permute.xlu1 %v2315_v28 }
 0x185   :  { %v1348_v27 = vpop.f32.mrf.mxu3  ;;  %v1330_v14 = vadd.f32 %v1329_v36, %v1311_v6 }
 0x187   :  { %v1362_v29 = vpop.f32.mrf.mxu0  ;;  %v1349_v21 = vadd.f32 %v1348_v27, %v1330_v14  ;;  %v1447_v27 = vmul.f32 %v1437_v44, %v1433_v25 }
 0x188   :  { %v1381_v46 = vpop.f32.mrf.mxu1  ;;  %v1363_v60 = vadd.f32 %v1362_v29, %v1344_v38  ;;  %v2230_v29 = vld [vmem:[#allocation2] ss:$0 sm:$0xff] }
 0x18a   :  { %v1382_v50 = vadd.f32 %v1381_v46, %v1363_v60 }
 0x18c   :  { %v1398_v37 = vpop.f32.mrf.mxu2 }
 0x18d   :  { %v1399_v39 = vadd.f32 %v1398_v37, %v1380_v34  ;;  %v1417_v42 = vpop.f32.mrf.mxu3 }
 0x18f   :  { %v1418_v48 = vadd.f32 %v1417_v42, %v1399_v39  ;;  %v1365_v61 = vpop.f32.mrf.mxu0 }
 0x190   :  { %v1366_v8 = vadd.f32 %v1365_v61, %v1347_v1  ;;  %v1384_v13 = vpop.f32.mrf.mxu1 }
 0x191   :  { %v1428_v53 = vmax.f32 %v1418_v48, 0.0 }
 0x192   :  { %v1385_v12 = vadd.f32 %v1384_v13, %v1366_v8 }
 0x193   :  { %v1442_v58 = vmul.f32 %v1438_v49, %v1428_v53 }
 0x194   :  { %v1400_v62 = vpop.f32.mrf.mxu2 }
 0x195   :  { %v1401_v3 = vadd.f32 %v1400_v62, %v1382_v50  ;;  %v1419_v4 = vpop.f32.mrf.mxu3  ;;  %v1449_v5 = vadd.f32 %v1442_v58, %v1441_v57 }
 0x197   :  { %v1420_v9 = vadd.f32 %v1419_v4, %v1401_v3  ;;  %1450 = vadd.xlane.f32.xlu0 %v1449_v5  ;;  %v1367_v30 = vpop.f32.mrf.mxu0 }
 0x198   :  { %v1368_v54 = vadd.f32 %v1367_v30, %v1349_v21  ;;  %v1386_v16 = vpop.f32.mrf.mxu1 }
 0x199   :  { %v1430_v40 = vmax.f32 %v1420_v9, 0.0 }
 0x19a   :  { %v1387_v17 = vadd.f32 %v1386_v16, %v1368_v54 }
 0x19b   :  { %v1444_v59 = vmul.f32 %v1438_v49, %v1430_v40 }
 0x19c   :  { %v1403_v35 = vpop.f32.mrf.mxu2 }
 0x19d   :  { %v1404_v26 = vadd.f32 %v1403_v35, %v1385_v12  ;;  %v1422_v0 = vpop.f32.mrf.mxu3  ;;  %v1452_v2 = vadd.f32 %v1444_v59, %v1443_v7 }
 0x19f   :  { %v1423_v63 = vadd.f32 %v1422_v0, %v1404_v26  ;;  %1453 = vadd.xlane.f32.xlu0 %v1452_v2 }
 0x1a1   :  { %v1432_v15 = vmax.f32 %v1423_v63, 0.0 }
 0x1a3   :  { %v1446_v45 = vmul.f32 %v1438_v49, %v1432_v15 }
 0x1a4   :  { %v1405_v20 = vpop.f32.mrf.mxu2 }
 0x1a5   :  { %v1406_v22 = vadd.f32 %v1405_v20, %v1387_v17  ;;  %v1455_v19 = vadd.f32 %v1446_v45, %v1445_v18  ;;  %v1424_v23 = vpop.f32.mrf.mxu3 }
 0x1a7   :  { %v1425_v36 = vadd.f32 %v1424_v23, %v1406_v22  ;;  %1456 = vadd.xlane.f32.xlu1 %v1455_v19 }
 0x1a9   :  { %v1434_v11 = vmax.f32 %v1425_v36, 0.0 }
 0x1ab   :  { %v1448_v24 = vmul.f32 %v1438_v49, %v1434_v11 }
 0x1ad   :  { %v1458_v10 = vadd.f32 %v1448_v24, %v1447_v27 }
 0x1af   :  { %1459 = vadd.xlane.f32.xlu1 %v1458_v10 }
 0x20a   :  { %v1451_v31 = vpop.xlane.xlu0 %1450 }
 0x20b   :  { %v1465_v33 = vadd.f32 %v2230_v29, %v1451_v31 }
 0x20d   :  { %1471 = vperm.xlu2 %2227, %v1465_v33  }
 0x212   :  { %v1454_v32 = vpop.xlane.xlu0 %1453 }
 0x213   :  { %v1466_v34 = vadd.f32 %v2230_v29, %v1454_v32 }
 0x215   :  { %1476 = vperm.xlu2 %2227, %v1466_v34  }
 0x21a   :  { %v1457_v37 = vpop.xlane.xlu1 %1456 }
 0x21b   :  { %v1467_v55 = vadd.f32 %v2230_v29, %v1457_v37 }
 0x21d   :  { %1481 = vperm.xlu0 %2228, %v1467_v55  }
 0x222   :  { %v1460_v38 = vpop.xlane.xlu1 %1459 }
 0x223   :  { %v1468_v39 = vadd.f32 %v2230_v29, %v1460_v38 }
 0x225   :  { %1486 = vperm.xlu1 %2229, %v1468_v39  }
 0x267   :  { %v1472_v42 = vpop.permute.xlu2 %1471 }
 0x268   :  { %1489 = vst [vmem:[#allocation8] sm:$0xff] %v1472_v42 }
 0x26f   :  { %v1477_v43 = vpop.permute.xlu2 %1476 }
 0x270   :  { %1490 = vst [vmem:[#allocation8 + $0x8] sm:$0xff] %v1477_v43 }
 0x28f   :  { %v1482_v44 = vpop.permute.xlu0 %1481 }
 0x290   :  { %1491 = vst [vmem:[#allocation8 + $0x10] sm:$0xff] %v1482_v44 }
 0x297   :  { %v1487_v46 = vpop.permute.xlu1 %1486 }
 0x298   :  { %1492 = vst [vmem:[#allocation8 + $0x18] sm:$0xff] %v1487_v46 }
 0x299   :  { %1505 = dma.vmem_to_hbm [thread:$0]  %s1498_s21, 512, %s1500_s24, [#allocation5], %s2313_s14, %s2313_s14, %s2314_s15  }
 0x29a   :  { %2307 = dma.done.wait [#allocation5], 512  }
 0x29b   :  { %2308 = vsyncadd [#allocation5], 4294966784 }
 0x29c   :  { %1510 = vsyncpa [#allocation4], 1 }
 0x29d   :  { %1511 = vsyncpa [#allocation7], 1 }
 0x29e   :  { %1512 = vsyncpa [#allocation5], 1 }

</bundles_post_ra>
